<compile_context>
chip_gen: v7x
topology: tpu7x:2x2x1
jax: 0.10.0
libtpu: 0.0.40
codegen_flags: <defaults>
</compile_context>

<pallas_src>
import jax
import jax.numpy as jnp
import numpy as np
from jax.experimental import pallas as pl
from jax.experimental.pallas import tpu as pltpu


# ---------------------------------------------------------------------------
# Helpers
# ---------------------------------------------------------------------------
def _round_up(a, b):
    return (a + b - 1) // b * b


def _cdiv(a, b):
    return (a + b - 1) // b


def _vmem_capacity_bytes():
    try:
        return int(pltpu.get_tpu_info().vmem_capacity_bytes)
    except Exception:
        return 64 * 1024 * 1024          # conservative (v7x per-core VMEM)


def _spec(shape, index_map, *, single_buffer=False):
    """BlockSpec; optionally single-buffered (large constant operands on v7x)."""
    if single_buffer:
        try:
            return pl.BlockSpec(shape, index_map, pipeline_mode=pl.Buffered(1))
        except Exception:                # older JAX without pipeline_mode / Buffered(1)
            pass
    return pl.BlockSpec(shape, index_map)


def _folded_weight(w_conv):
    """[Cout, C, 2, 2] OIHW -> [4C, 4*Cout].

    Row blocks act on the features [x, x_right, x_down, x_downright]; column blocks are
    the output parities (py, px) = (0,0),(0,1),(1,0),(1,1), each Cout wide.
    """
    wt = jnp.transpose(w_conv, (2, 3, 1, 0))        # [kh, kw, C, Cout]
    w00, w01, w10, w11 = wt[0, 0], wt[0, 1], wt[1, 0], wt[1, 1]
    zero = jnp.zeros_like(w00)
    col00 = jnp.concatenate([w00 + w01 + w10 + w11, zero, zero, zero], axis=0)
    col01 = jnp.concatenate([w00 + w10, w01 + w11, zero, zero], axis=0)
    col10 = jnp.concatenate([w00 + w01, zero, w10 + w11, zero], axis=0)
    col11 = jnp.concatenate([w00, w01, w10, w11], axis=0)
    return jnp.concatenate([col00, col01, col10, col11], axis=1)   # [4C, 4*Cout]


def _pick_tiles(C, Cout, W, G, vmem_cap, single_w):
    """Row tile th (multiple of ts) and tail size ts from per-chip VMEM capacity."""
    ncol = 4 * Cout
    ts = _round_up(W + 2, 8)             # covers the largest row shift (W + 2)
    row_bytes = (2 * (C * 2)             # x row block (bf16), double-buffered
                 + (C * 4)               # f32 staging scratch
                 + 4 * (ncol * 4)        # f32 matmul result + stats temporaries
                 + 2 * 2 * (2 * Cout * 4))  # two f32 output blocks, double-buffered
    w_bufs = 1 if single_w else 2
    fixed = (w_bufs * (4 * C * ncol * 2)  # folded weight
             + 2 * (ts * C * 2)           # tail block
             + (2 << 20))                 # slack
    budget = int(vmem_cap * 0.55) - fixed
    th = max(ts, budget // max(row_bytes, 1))
    th = min(th, 4096)                               # bound temporaries / zero-padding
    th = min(th, _round_up(_cdiv(G, 2), ts))         # don't blow tiny problems up
    th = max(ts, th // ts * ts)
    return th, ts


# ---------------------------------------------------------------------------
# Forward
# ---------------------------------------------------------------------------
def upconv2x2_forward(x_nchw, w_conv, b_conv, gamma, beta, *, bn=True, eps=1e-5):
    """UpConv2x2 forward: [N, C, H, W] -> [N, C//2, 2H, 2W] (f32, training-mode BN)."""
    N, C, H, W = x_nchw.shape
    Cout = w_conv.shape[0]
    ncol = 4 * Cout                 # parity-packed matmul width (= 2C)
    half = 2 * Cout                 # lanes per output-row parity
    M = 4 * N * H * W               # BN population (all conv output pixels)

    vmem_cap = _vmem_capacity_bytes()
    vmem_limit = int(vmem_cap * 0.85)
    single_w = C >= 256

    # one matmul row per pixel of the zero-padded [N, H+1, W+1, C] image
    G = N * (H + 1) * (W + 1)
    th, ts = _pick_tiles(C, Cout, W, G, vmem_cap, single_w)
    tmul = th // ts
    G_pad = _round_up(G, 2 * th)    # multiple of 2*th -> stats pass always splits 2-way
    nb_total = G_pad // th
    n_split = 2                     # megacore split for pass 1 (v7x); harmless on 1 TC
    nb = nb_total // n_split

    # ---- glue: zero-padded NHWC bf16, flattened to one row per (padded) pixel.
    # Row offsets of the four conv taps in this layout: 0 (self), 1 (right),
    # W+1 (down), W+2 (down-right); the pad row/column supplies the boundary zeros,
    # and an extra ts zero rows at the end feed the tail block of the last grid step.
    x_nhwc = jnp.transpose(x_nchw, (0, 2, 3, 1)).astype(jnp.bfloat16)
    x_padded = jnp.pad(x_nhwc, ((0, 0), (0, 1), (0, 1), (0, 0)))
    x_flat = jnp.pad(x_padded.reshape(G, C), ((0, G_pad + ts - G), (0, 0)))

    wf = _folded_weight(w_conv.astype(jnp.float32))            # [4C, ncol] f32
    w4 = wf.reshape(4, C, ncol)                                # per-tap weight blocks

    shifts = (0, 1, W + 1, W + 2)

    def _conv_block(xc_ref, xt_ref, w_ref, xx_ref):
        # Stage the row block + tail contiguously (f32 scratch: unaligned row reads are
        # the plain 32-bit path), then feed the MXU with the four shifted bf16 views.
        xx_ref[pl.ds(0, th), :] = xc_ref[...].astype(jnp.float32)
        xx_ref[pl.ds(th, ts), :] = xt_ref[...].astype(jnp.float32)
        z = jnp.dot(xc_ref[...], w_ref[0], preferred_element_type=jnp.float32)
        for k in (1, 2, 3):
            xk = xx_ref[pl.ds(shifts[k], th), :].astype(jnp.bfloat16)
            z = z + jnp.dot(xk, w_ref[k], preferred_element_type=jnp.float32)
        return z

    def stats_kernel(xc_ref, xt_ref, m_ref, w_ref, sum_ref, sq_ref, xx_ref):
        @pl.when(pl.program_id(1) == 0)
        def _():
            sum_ref[...] = jnp.zeros_like(sum_ref)
            sq_ref[...] = jnp.zeros_like(sq_ref)
        # bias-free conv, pad rows masked out of the statistics
        z = _conv_block(xc_ref, xt_ref, w_ref, xx_ref) * m_ref[...]
        zs = z.reshape(th // 8, 8, ncol)          # keep 8 sublane partial sums
        sum_ref[...] += jnp.sum(zs, axis=0)
        sq_ref[...] += jnp.sum(zs * zs, axis=0)

    def out_kernel(xc_ref, xt_ref, w_ref, b_ref, oe_ref, oo_ref, xx_ref):
        z = _conv_block(xc_ref, xt_ref, w_ref, xx_ref) + b_ref[...]
        oe_ref[...] = z[:, :half].astype(oe_ref.dtype)    # output rows 2h
        oo_ref[...] = z[:, half:].astype(oo_ref.dtype)    # output rows 2h+1

    mm_flops = int(2 * G_pad * 4 * C * ncol)
    x_bytes = int((G_pad + ts) * C * 2 + G_pad * C * 2 // max(tmul, 1))
    w_bytes = int(4 * C * ncol * 2)

    # ---- pass 1: bias-free conv -> per-(parity, channel) sum / sum-of-squares ----
    if bn:
        valid = jnp.pad(jnp.ones((H, W), jnp.float32), ((0, 1), (0, 1)))
        mask = jnp.broadcast_to(valid[None], (N, H + 1, W + 1)).reshape(G, 1)
        mask = jnp.pad(mask, ((0, G_pad - G), (0, 0)))

        s, sq = pl.pallas_call(
            stats_kernel,
            out_shape=(jax.ShapeDtypeStruct((8 * n_split, ncol), jnp.float32),
                       jax.ShapeDtypeStruct((8 * n_split, ncol), jnp.float32)),
            grid_spec=pltpu.PrefetchScalarGridSpec(
                num_scalar_prefetch=0,
                grid=(n_split, nb),
                in_specs=[
                    pl.BlockSpec((th, C), lambda q, i: (q * nb + i, 0)),
                    pl.BlockSpec((ts, C), lambda q, i: ((q * nb + i + 1) * tmul, 0)),
                    pl.BlockSpec((th, 1), lambda q, i: (q * nb + i, 0)),
                    _spec((4, C, ncol), lambda q, i: (0, 0, 0), single_buffer=single_w),
                ],
                out_specs=(pl.BlockSpec((8, ncol), lambda q, i: (q, 0)),
                           pl.BlockSpec((8, ncol), lambda q, i: (q, 0))),
                scratch_shapes=[pltpu.VMEM((th + ts, C), jnp.float32)],
            ),
            compiler_params=pltpu.CompilerParams(
                dimension_semantics=("parallel", "arbitrary"),
                vmem_limit_bytes=vmem_limit),
            cost_estimate=pl.CostEstimate(
                flops=mm_flops, transcendentals=0,
                bytes_accessed=x_bytes + w_bytes + int(G_pad * 4)),
        )(x_flat, x_flat, mask, w4.astype(jnp.bfloat16))

        # reduce over (shards, sublane partials) and the 4 parities -> [Cout]
        sum_z = jnp.sum(s.reshape(-1, 4, Cout), axis=(0, 1))
        sum_z2 = jnp.sum(sq.reshape(-1, 4, Cout), axis=(0, 1))
        mean_z = sum_z / M
        var = sum_z2 / M - mean_z * mean_z        # bias-free z: var(y) == var(z)
        inv = jax.lax.rsqrt(var + eps)
        scale = gamma.astype(jnp.float32) * inv
        # y_bn = (z + b - (mean_z + b)) * scale + beta = z * scale + (beta - mean_z*scale)
        w_use = (w4 * jnp.tile(scale, 4)[None, None, :]).astype(jnp.bfloat16)
        b_use = jnp.tile(beta.astype(jnp.float32) - mean_z * scale, 4).reshape(1, ncol)
    else:
        w_use = w4.astype(jnp.bfloat16)
        b_use = jnp.tile(b_conv.astype(jnp.float32), 4).reshape(1, ncol)

    # ---- pass 2: final matmul (BN folded); even / odd output rows, lane-packed NHWC ----
    out_e, out_o = pl.pallas_call(
        out_kernel,
        out_shape=(jax.ShapeDtypeStruct((G_pad, half), jnp.float32),
                   jax.ShapeDtypeStruct((G_pad, half), jnp.float32)),
        grid_spec=pltpu.PrefetchScalarGridSpec(
            num_scalar_prefetch=0,
            grid=(nb_total,),
            in_specs=[
                pl.BlockSpec((th, C), lambda i: (i, 0)),
                pl.BlockSpec((ts, C), lambda i: ((i + 1) * tmul, 0)),
                _spec((4, C, ncol), lambda i: (0, 0, 0), single_buffer=single_w),
                pl.BlockSpec((1, ncol), lambda i: (0, 0)),
            ],
            out_specs=(pl.BlockSpec((th, half), lambda i: (i, 0)),
                       pl.BlockSpec((th, half), lambda i: (i, 0))),
            scratch_shapes=[pltpu.VMEM((th + ts, C), jnp.float32)],
        ),
        compiler_params=pltpu.CompilerParams(
            dimension_semantics=("parallel",),
            vmem_limit_bytes=vmem_limit),
        cost_estimate=pl.CostEstimate(
            flops=mm_flops, transcendentals=0,
            bytes_accessed=x_bytes + w_bytes + int(G_pad * ncol * 4)),
    )(x_flat, x_flat, w_use, b_use)

    # ---- glue: drop pad pixels, interleave even/odd rows, back to NCHW.  The px-parity
    # unpack already happened inside the kernel (column order of the folded weight), so
    # this is a single fused slice + interleave + transpose over the output.
    ye = out_e[:G].reshape(N, H + 1, W + 1, 2, Cout)[:, :H, :W].reshape(N, H, 2 * W, Cout)
    yo = out_o[:G].reshape(N, H + 1, W + 1, 2, Cout)[:, :H, :W].reshape(N, H, 2 * W, Cout)
    y = jnp.stack([ye, yo], axis=2).reshape(N, 2 * H, 2 * W, Cout)
    return jnp.transpose(y, (0, 3, 1, 2))
    # TODO(synk): BatchNorm running_mean/running_var (momentum=0.001) update is module
    # state, not part of the returned tensor; not modeled here.


# ---------------------------------------------------------------------------
# Plain-JAX reference (independent f32 path) for correctness checking.
# ---------------------------------------------------------------------------
def reference(x, w, b, gamma, beta, *, bn=True, eps=1e-5):
    xu = jnp.repeat(jnp.repeat(x, 2, axis=2), 2, axis=3)
    xp = jnp.pad(xu, ((0, 0), (0, 0), (0, 1), (0, 1)))
    y = jax.lax.conv_general_dilated(
        xp, w, (1, 1), 'VALID',
        dimension_numbers=('NCHW', 'OIHW', 'NCHW')) + b.reshape(1, -1, 1, 1)
    if not bn:
        return y
    mean = jnp.mean(y, axis=(0, 2, 3), keepdims=True)
    var = jnp.mean((y - mean) ** 2, axis=(0, 2, 3), keepdims=True)
    return ((y - mean) / jnp.sqrt(var + eps)
            * gamma.reshape(1, -1, 1, 1) + beta.reshape(1, -1, 1, 1))


if __name__ == "__main__":
    # UpConv2x2(channels=4): Conv2d(4 -> 2, kernel_size=2), BatchNorm2d(2)
    N, C, H, W = 2, 4, 16, 16
    Cout = C // 2

    key = jax.random.PRNGKey(0)
    kx, kw, kb = jax.random.split(key, 3)
    x = jax.random.normal(kx, (N, C, H, W), dtype=jnp.float32)
    fan_in = C * 2 * 2
    bound = 1.0 / np.sqrt(fan_in)
    w_conv = jax.random.uniform(kw, (Cout, C, 2, 2), jnp.float32, -bound, bound)
    b_conv = jax.random.uniform(kb, (Cout,), jnp.float32, -bound, bound)
    gamma = jnp.ones((Cout,), jnp.float32)   # torch BatchNorm2d default init
    beta = jnp.zeros((Cout,), jnp.float32)

    out = jax.block_until_ready(
        upconv2x2_forward(x, w_conv, b_conv, gamma, beta, bn=True))
    ref = jax.block_until_ready(reference(x, w_conv, b_conv, gamma, beta, bn=True))
    assert out.shape == (N, Cout, 2 * H, 2 * W), out.shape
    # bf16 MXU operands dominate the tolerance vs. the pure-f32 reference.
    np.testing.assert_allclose(np.asarray(out), np.asarray(ref),
                               rtol=2e-2, atol=2e-2)

    out_nobn = jax.block_until_ready(
        upconv2x2_forward(x, w_conv, b_conv, gamma, beta, bn=False))
    ref_nobn = jax.block_until_ready(
        reference(x, w_conv, b_conv, gamma, beta, bn=False))
    np.testing.assert_allclose(np.asarray(out_nobn), np.asarray(ref_nobn),
                               rtol=2e-2, atol=2e-2)

    print("KERNEL_OK")
</pallas_src>

<mosaic_0001>
module attributes {stable_mosaic.version = 11 : i64} {
  func.func @stats_kernel(%arg0: i32, %arg1: i32, %arg2: memref<312x4xbf16, #tpu.memory_space<vmem>>, %arg3: memref<24x4xbf16, #tpu.memory_space<vmem>>, %arg4: memref<312x1xf32, #tpu.memory_space<vmem>>, %arg5: memref<4x4x8xbf16, #tpu.memory_space<vmem>>, %arg6: memref<8x8xf32, #tpu.memory_space<vmem>>, %arg7: memref<8x8xf32, #tpu.memory_space<vmem>>, %arg8: memref<336x4xf32, #tpu.memory_space<vmem>>) attributes {dimension_semantics = [#tpu.dimension_semantics<parallel>, #tpu.dimension_semantics<arbitrary>], iteration_bounds = array<i64: 2, 1>, scalar_prefetch = 0 : i64, scratch_operands = 1 : i64, tpu.core_type = #tpu.core_type<tc>, window_params = [{transform_indices = @transform_0, window_bounds = array<i64: 312, 4>}, {transform_indices = @transform_1, window_bounds = array<i64: 24, 4>}, {transform_indices = @transform_2, window_bounds = array<i64: 312, 1>}, {pipeline_mode = #tpu.pipeline_mode<synchronous>, transform_indices = @transform_3, window_bounds = array<i64: 4, 4, 8>}, {transform_indices = @transform_4, window_bounds = array<i64: 8, 8>}, {transform_indices = @transform_5, window_bounds = array<i64: 8, 8>}]} {
    %c0_i32 = arith.constant 0 : i32
    %0 = arith.cmpi eq, %arg1, %c0_i32 : i32
    %1 = arith.extui %0 : i1 to i32
    %c0_i32_0 = arith.constant 0 : i32
    %2 = arith.cmpi ne, %1, %c0_i32_0 : i32
    scf.if %2 {
      %cst_37 = arith.constant 0.000000e+00 : f32
      %44 = vector.broadcast %cst_37 : f32 to vector<8x8xf32>
      %c0_38 = arith.constant 0 : index
      %c0_39 = arith.constant 0 : index
      %45 = vector.load %arg6[%c0_38, %c0_39] : memref<8x8xf32, #tpu.memory_space<vmem>>, vector<8x8xf32>
      tpu.vector_store %arg6[%c0_38, %c0_39], %44 {strides = array<i32>} : memref<8x8xf32, #tpu.memory_space<vmem>>, vector<8x8xf32>,
      %cst_40 = arith.constant 0.000000e+00 : f32
      %46 = vector.broadcast %cst_40 : f32 to vector<8x8xf32>
      %c0_41 = arith.constant 0 : index
      %c0_42 = arith.constant 0 : index
      %47 = vector.load %arg7[%c0_41, %c0_42] : memref<8x8xf32, #tpu.memory_space<vmem>>, vector<8x8xf32>
      tpu.vector_store %arg7[%c0_41, %c0_42], %46 {strides = array<i32>} : memref<8x8xf32, #tpu.memory_space<vmem>>, vector<8x8xf32>,
    } else {
    }
    %c0 = arith.constant 0 : index
    %c0_1 = arith.constant 0 : index
    %3 = vector.load %arg2[%c0, %c0_1] : memref<312x4xbf16, #tpu.memory_space<vmem>>, vector<312x4xbf16>
    %4 = arith.extf %3 : vector<312x4xbf16> to vector<312x4xf32>
    %c0_2 = arith.constant 0 : index
    %c0_3 = arith.constant 0 : index
    %5 = vector.load %arg8[%c0_2, %c0_3] : memref<336x4xf32, #tpu.memory_space<vmem>>, vector<312x4xf32>
    tpu.vector_store %arg8[%c0_2, %c0_3], %4 {strides = array<i32>} : memref<336x4xf32, #tpu.memory_space<vmem>>, vector<312x4xf32>,
    %c0_4 = arith.constant 0 : index
    %c0_5 = arith.constant 0 : index
    %6 = vector.load %arg3[%c0_4, %c0_5] : memref<24x4xbf16, #tpu.memory_space<vmem>>, vector<24x4xbf16>
    %7 = arith.extf %6 : vector<24x4xbf16> to vector<24x4xf32>
    %c312 = arith.constant 312 : index
    %c0_6 = arith.constant 0 : index
    %8 = vector.load %arg8[%c312, %c0_6] : memref<336x4xf32, #tpu.memory_space<vmem>>, vector<24x4xf32>
    tpu.vector_store %arg8[%c312, %c0_6], %7 {strides = array<i32>} : memref<336x4xf32, #tpu.memory_space<vmem>>, vector<24x4xf32>,
    %c0_7 = arith.constant 0 : index
    %c0_8 = arith.constant 0 : index
    %9 = vector.load %arg2[%c0_7, %c0_8] : memref<312x4xbf16, #tpu.memory_space<vmem>>, vector<312x4xbf16>
    %c0_9 = arith.constant 0 : index
    %c0_10 = arith.constant 0 : index
    %c0_11 = arith.constant 0 : index
    %10 = vector.load %arg5[%c0_9, %c0_10, %c0_11] : memref<4x4x8xbf16, #tpu.memory_space<vmem>>, vector<1x4x8xbf16>
    %11 = vector.shape_cast %10 : vector<1x4x8xbf16> to vector<4x8xbf16>
    %cst = arith.constant dense<0.000000e+00> : vector<312x8xf32>
    %12 = tpu.matmul %9, %11, %cst {dimension_numbers = #tpu.dot_dimension_numbers<[1], [0], [0], [1], [0, 0, 1, 1], [], []>} : vector<312x4xbf16>, vector<4x8xbf16>, vector<312x8xf32> -> vector<312x8xf32>
    %c1 = arith.constant 1 : index
    %c0_12 = arith.constant 0 : index
    %13 = vector.load %arg8[%c1, %c0_12] : memref<336x4xf32, #tpu.memory_space<vmem>>, vector<312x4xf32>
    %14 = arith.truncf %13 : vector<312x4xf32> to vector<312x4xbf16>
    %c1_13 = arith.constant 1 : index
    %c0_14 = arith.constant 0 : index
    %c0_15 = arith.constant 0 : index
    %15 = vector.load %arg5[%c1_13, %c0_14, %c0_15] : memref<4x4x8xbf16, #tpu.memory_space<vmem>>, vector<1x4x8xbf16>
    %16 = vector.shape_cast %15 : vector<1x4x8xbf16> to vector<4x8xbf16>
    %cst_16 = arith.constant dense<0.000000e+00> : vector<312x8xf32>
    %17 = tpu.matmul %14, %16, %cst_16 {dimension_numbers = #tpu.dot_dimension_numbers<[1], [0], [0], [1], [0, 0, 1, 1], [], []>} : vector<312x4xbf16>, vector<4x8xbf16>, vector<312x8xf32> -> vector<312x8xf32>
    %18 = arith.addf %12, %17 : vector<312x8xf32>
    %c17 = arith.constant 17 : index
    %c0_17 = arith.constant 0 : index
    %19 = vector.load %arg8[%c17, %c0_17] : memref<336x4xf32, #tpu.memory_space<vmem>>, vector<312x4xf32>
    %20 = arith.truncf %19 : vector<312x4xf32> to vector<312x4xbf16>
    %c2 = arith.constant 2 : index
    %c0_18 = arith.constant 0 : index
    %c0_19 = arith.constant 0 : index
    %21 = vector.load %arg5[%c2, %c0_18, %c0_19] : memref<4x4x8xbf16, #tpu.memory_space<vmem>>, vector<1x4x8xbf16>
    %22 = vector.shape_cast %21 : vector<1x4x8xbf16> to vector<4x8xbf16>
    %cst_20 = arith.constant dense<0.000000e+00> : vector<312x8xf32>
    %23 = tpu.matmul %20, %22, %cst_20 {dimension_numbers = #tpu.dot_dimension_numbers<[1], [0], [0], [1], [0, 0, 1, 1], [], []>} : vector<312x4xbf16>, vector<4x8xbf16>, vector<312x8xf32> -> vector<312x8xf32>
    %24 = arith.addf %18, %23 : vector<312x8xf32>
    %c18 = arith.constant 18 : index
    %c0_21 = arith.constant 0 : index
    %25 = vector.load %arg8[%c18, %c0_21] : memref<336x4xf32, #tpu.memory_space<vmem>>, vector<312x4xf32>
    %26 = arith.truncf %25 : vector<312x4xf32> to vector<312x4xbf16>
    %c3 = arith.constant 3 : index
    %c0_22 = arith.constant 0 : index
    %c0_23 = arith.constant 0 : index
    %27 = vector.load %arg5[%c3, %c0_22, %c0_23] : memref<4x4x8xbf16, #tpu.memory_space<vmem>>, vector<1x4x8xbf16>
    %28 = vector.shape_cast %27 : vector<1x4x8xbf16> to vector<4x8xbf16>
    %cst_24 = arith.constant dense<0.000000e+00> : vector<312x8xf32>
    %29 = tpu.matmul %26, %28, %cst_24 {dimension_numbers = #tpu.dot_dimension_numbers<[1], [0], [0], [1], [0, 0, 1, 1], [], []>} : vector<312x4xbf16>, vector<4x8xbf16>, vector<312x8xf32> -> vector<312x8xf32>
    %30 = arith.addf %24, %29 : vector<312x8xf32>
    %c0_25 = arith.constant 0 : index
    %c0_26 = arith.constant 0 : index
    %31 = vector.load %arg4[%c0_25, %c0_26] : memref<312x1xf32, #tpu.memory_space<vmem>>, vector<312x1xf32>
    %32 = vector.broadcast %31 : vector<312x1xf32> to vector<312x8xf32>
    %33 = arith.mulf %30, %32 : vector<312x8xf32>
    %34 = vector.shape_cast %33 : vector<312x8xf32> to vector<39x8x8xf32>
    %c0_27 = arith.constant 0 : index
    %c0_28 = arith.constant 0 : index
    %35 = vector.load %arg6[%c0_27, %c0_28] : memref<8x8xf32, #tpu.memory_space<vmem>>, vector<8x8xf32>
    %cst_29 = arith.constant dense<0.000000e+00> : vector<8x8xf32>
    %36 = vector.multi_reduction <add>, %34, %cst_29 [0] : vector<39x8x8xf32> to vector<8x8xf32>
    %37 = arith.addf %35, %36 : vector<8x8xf32>
    %c0_30 = arith.constant 0 : index
    %c0_31 = arith.constant 0 : index
    %38 = vector.load %arg6[%c0_30, %c0_31] : memref<8x8xf32, #tpu.memory_space<vmem>>, vector<8x8xf32>
    tpu.vector_store %arg6[%c0_30, %c0_31], %37 {strides = array<i32>} : memref<8x8xf32, #tpu.memory_space<vmem>>, vector<8x8xf32>,
    %c0_32 = arith.constant 0 : index
    %c0_33 = arith.constant 0 : index
    %39 = vector.load %arg7[%c0_32, %c0_33] : memref<8x8xf32, #tpu.memory_space<vmem>>, vector<8x8xf32>
    %40 = arith.mulf %34, %34 : vector<39x8x8xf32>
    %cst_34 = arith.constant dense<0.000000e+00> : vector<8x8xf32>
    %41 = vector.multi_reduction <add>, %40, %cst_34 [0] : vector<39x8x8xf32> to vector<8x8xf32>
    %42 = arith.addf %39, %41 : vector<8x8xf32>
    %c0_35 = arith.constant 0 : index
    %c0_36 = arith.constant 0 : index
    %43 = vector.load %arg7[%c0_35, %c0_36] : memref<8x8xf32, #tpu.memory_space<vmem>>, vector<8x8xf32>
    tpu.vector_store %arg7[%c0_35, %c0_36], %42 {strides = array<i32>} : memref<8x8xf32, #tpu.memory_space<vmem>>, vector<8x8xf32>,
    return
  }
  func.func @transform_0(%arg0: i32, %arg1: i32) -> (i32, i32) {
    %c1_i32 = arith.constant 1 : i32
    %0 = arith.muli %arg0, %c1_i32 : i32
    %1 = arith.addi %0, %arg1 : i32
    %c0_i32 = arith.constant 0 : i32
    %c0_i32_0 = arith.constant 0 : i32
    return %1, %c0_i32 : i32, i32
  }
  func.func @transform_1(%arg0: i32, %arg1: i32) -> (i32, i32) {
    %c1_i32 = arith.constant 1 : i32
    %0 = arith.muli %arg0, %c1_i32 : i32
    %1 = arith.addi %0, %arg1 : i32
    %c1_i32_0 = arith.constant 1 : i32
    %2 = arith.addi %1, %c1_i32_0 : i32
    %c13_i32 = arith.constant 13 : i32
    %3 = arith.muli %2, %c13_i32 : i32
    %c0_i32 = arith.constant 0 : i32
    %c0_i32_1 = arith.constant 0 : i32
    return %3, %c0_i32 : i32, i32
  }
  func.func @transform_2(%arg0: i32, %arg1: i32) -> (i32, i32) {
    %c1_i32 = arith.constant 1 : i32
    %0 = arith.muli %arg0, %c1_i32 : i32
    %1 = arith.addi %0, %arg1 : i32
    %c0_i32 = arith.constant 0 : i32
    %c0_i32_0 = arith.constant 0 : i32
    return %1, %c0_i32 : i32, i32
  }
  func.func @transform_3(%arg0: i32, %arg1: i32) -> (i32, i32, i32) {
    %c0_i32 = arith.constant 0 : i32
    %c0_i32_0 = arith.constant 0 : i32
    %c0_i32_1 = arith.constant 0 : i32
    %c0_i32_2 = arith.constant 0 : i32
    return %c0_i32, %c0_i32_0, %c0_i32_1 : i32, i32, i32
  }
  func.func @transform_4(%arg0: i32, %arg1: i32) -> (i32, i32) {
    %c0_i32 = arith.constant 0 : i32
    %c0_i32_0 = arith.constant 0 : i32
    return %arg0, %c0_i32 : i32, i32
  }
  func.func @transform_5(%arg0: i32, %arg1: i32) -> (i32, i32) {
    %c0_i32 = arith.constant 0 : i32
    %c0_i32_0 = arith.constant 0 : i32
    return %arg0, %c0_i32 : i32, i32
  }
}

</mosaic_0001>

<bundles_post_ra>
// kernel: tpu_custom_call.1
= control target key start
LH: loop header
LB: loop body
LE: loop exit
PB: predicated region body
PF: predicated region fallthrough
CT: control target
= control target key end

     0   :  { %s3184_s18 = smov 0   ;;  %s3186_s19 = smov 0   ;;  %s3648_s0 = inlined_call_operand.vmem [shape: bf16[648,4], index: 0, kind: input, shape index: {}]   ;;  %s3649_s1 = inlined_call_operand.vmem [shape: bf16[648,4], index: 1, kind: input, shape index: {}]   ;;  %s3650_s2 = inlined_call_operand.vmem [shape: f32[624,1], index: 2, kind: input, shape index: {}]   ;;  %s3651_s3 = inlined_call_operand.vmem [shape: bf16[4,4,8], index: 3, kind: input, shape index: {}]   ;;  %s3652_s4 = inlined_call_operand.vmem [shape: f32[16,8], index: 4, kind: output, shape index: {0}]   ;;  %s3653_s5 = inlined_call_operand.vmem [shape: f32[16,8], index: 5, kind: output, shape index: {1}]  }
   0x1   :  { %s3188_s20 = smov 0  }
   0x2 LB: > { %s28_s21 = sadd.s32 1, %s3146_s19  ;;  %p2495_p0 = scmp.ge.s32.totalorder %s3150_s20, 1  ;;  %s3150_s20 = sphi %s3188_s20, %s16_s20   ;;  %s3146_s19 = sphi %s3186_s19, %s3655_s19   ;;  %s3142_s18 = sphi %s3184_s18, %s3654_s18  }
   0x3   : > { %p30_p1 = scmp.ge.s32.totalorder %s28_s21, 2  ;;  %p253_p2 = scmp.lt.s32.totalorder %s3150_s20, 3 }
   0x5   : > { %s3657_s21 = smov (%p30_p1, %s28_s21), 0  ;;  %p254_p3 = pnand %p2495_p0, %p253_p2 }
   0x6   : > { %v2502_v0 = vld [vmem:[%s3651_s3 + $0x2] sm:$0x3] (!%p254_p3)  ;;  %vm643_vm0 = vcmask (!%p254_p3), 1041408   ;;  %v2563_v1 = vld [vmem:[%s3651_s3 + $0x4] sm:$0x3] (!%p254_p3)  ;;  %s3211_s26 = smul.u32 (!%p254_p3), 39, %s3142_s18 }
   0x7   : > { %257 = sbr.rel (%p254_p3) target bundleno = 415 (0x19f), region = 36  ;;  %3076 = vmatprep.subr.msk.bf16.mxu1 (!%p254_p3), %vm643_vm0, %v2502_v0  ;;  %3078 = vmatprep.subr.msk.bf16.mxu0 (!%p254_p3), %vm643_vm0, %v2563_v1  ;;  %v645_v2 = vsel (!%p254_p3), %vm643_vm0, %v2502_v0, 0  ;;  %v1314_v3 = vsel (!%p254_p3), %vm643_vm0, %v2563_v1, 0  ;;  %v3220_v4 = vld [vmem:[%s3651_s3] sm:$0x3] (!%p254_p3)  ;;  %s320_s29 = sadd.s32 (!%p254_p3), 1, %s3142_s18 }
   0x8   : > { %2790 = vmatpush3.bf16.msra.mxu1 (!%p254_p3), %v645_v2  ;;  %2874 = vmatpush3.bf16.msra.mxu0 (!%p254_p3), %v1314_v3  ;;  %p309_p4 = scmp.lt.s32.totalorder (!%p254_p3), %s3211_s26, 80  ;;  %v3227_v5 = vld [vmem:[%s3651_s3 + $0x6] sm:$0x3] (!%p254_p3)  ;;  %s2497_s7 = smul.u32 (!%p254_p3), 39, %s320_s29  ;;  %v3152_v6 = vmov (!%p254_p3), 0   ;;  %vm433_vm1 = vcmask (!%p254_p3), 31744  }
   0x9   : > { %3077 = vmatprep.subr.msk.bf16.mxu1 (!%p254_p3), %vm643_vm0, %v3220_v4  ;;  %3079 = vmatprep.subr.msk.bf16.mxu0 (!%p254_p3), %vm643_vm0, %v3227_v5  ;;  %p333_p6 = scmp.lt.s32.totalorder (!%p254_p3), %s3211_s26, 77  ;;  %p339_p7 = scmp.lt.s32.totalorder (!%p254_p3), %s3142_s18, 1  ;;  %vm352_vm2 = vcmask (!%p254_p3), 64512  }
   0xa   : > { %3106 = vset.pattern.permute.xlu0 (!%p254_p3), %v3152_v6  ;;  %3107 = vset.pattern.permute.xlu1 (!%p254_p3), %v3152_v6  ;;  %p323_p5 = scmp.lt.s32.totalorder (!%p254_p3), %s2497_s7, 80 }
   0xe   : > { %s310_s8 = scalar_select %p309_p4, %s3211_s26, 80 }
   0xf   : > { %s3659_s7 = smov (!%p323_p5, %s2497_s7), 80  ;;  %s3661_s26 = smov (!%p333_p6, %s3211_s26), 77 }
  0x10   : > { %s2496_s9 = sshll.u32 %s310_s8, 2  ;;  %s2498_s13 = sshll.u32 %s3659_s7, 2 }
  0x11   : > { %s3237_s12 = scalar_lea.vmem %s3648_s0, %s2496_s9  ;;  %s3267_s16 = scalar_lea.vmem %s3649_s1, %s2498_s13 }
  0x12   : > { %v2608_v7 = vld [vmem:[%s3237_s12] sm:$0xff]   ;;  %v2687_v8 = vld [vmem:[%s3237_s12 + $0x8] sm:$0xff]   ;;  %v2688_v9 = vld [vmem:[%s3237_s12 + $0x10] sm:$0xff]   ;;  %s2499_s17 = sshll.u32 %s3661_s26, 3  ;;  %s3663_s18 = smov (!%p339_p7, %s3142_s18), 1 }
  0x13   : > { %v2609_v10 = vunpack.c.l.bf16 %v2608_v7  ;;  %v2610_v11 = vunpack.c.h.bf16 %v2608_v7  ;;  %v2613_v12 = vunpack.c.l.bf16 %v2687_v8  ;;  %v2614_v13 = vunpack.c.h.bf16 %v2687_v8  ;;  %v2689_v14 = vld [vmem:[%s3237_s12 + $0x18] sm:$0xff]   ;;  %v2690_v15 = vld [vmem:[%s3237_s12 + $0x20] sm:$0xff]   ;;  %v2691_v16 = vld [vmem:[%s3237_s12 + $0x28] sm:$0xff]   ;;  %s3330_s24 = scalar_lea.vmem %s3650_s2, %s2499_s17  ;;  %s2500_s25 = sshll.u32 %s3663_s18, 3 }
  0x14   : > { %v2617_v17 = vunpack.c.l.bf16 %v2688_v9  ;;  %v2618_v18 = vunpack.c.h.bf16 %v2688_v9  ;;  %v2621_v19 = vunpack.c.l.bf16 %v2689_v14  ;;  %v2622_v20 = vunpack.c.h.bf16 %v2689_v14  ;;  %v2692_v21 = vld [vmem:[%s3237_s12 + $0x30] sm:$0xff]   ;;  %v2693_v22 = vld [vmem:[%s3237_s12 + $0x38] sm:$0xff]   ;;  %v2694_v23 = vld [vmem:[%s3237_s12 + $0x40] sm:$0xff]   ;;  %s3466_s28 = scalar_lea.vmem %s3652_s4, %s2500_s25  ;;  %s3473_s6 = scalar_lea.vmem %s3653_s5, %s2500_s25 }
  0x15   : > { %434 = vst.msk [vmem:[#allocation2] sm:$0xff] %vm433_vm1, %v2609_v10  ;;  %435 = vst.msk [vmem:[#allocation2 + $0x8] sm:$0xff] %vm433_vm1, %v2610_v11  ;;  %v2625_v24 = vunpack.c.l.bf16 %v2690_v15  ;;  %v2626_v25 = vunpack.c.h.bf16 %v2690_v15  ;;  %v2629_v26 = vunpack.c.l.bf16 %v2691_v16  ;;  %v2630_v27 = vunpack.c.h.bf16 %v2691_v16  ;;  %v2695_v28 = vld [vmem:[%s3237_s12 + $0x48] sm:$0xff]   ;;  %v2696_v29 = vld [vmem:[%s3237_s12 + $0x50] sm:$0xff]  }
  0x16   : > { %436 = vst.msk [vmem:[#allocation2 + $0x10] sm:$0xff] %vm433_vm1, %v2613_v12  ;;  %437 = vst.msk [vmem:[#allocation2 + $0x18] sm:$0xff] %vm433_vm1, %v2614_v13  ;;  %v2697_v30 = vld [vmem:[%s3237_s12 + $0x58] sm:$0xff]   ;;  %v2633_v31 = vunpack.c.l.bf16 %v2692_v21  ;;  %v2634_v32 = vunpack.c.h.bf16 %v2692_v21  ;;  %v2637_v33 = vunpack.c.l.bf16 %v2693_v22  ;;  %v2638_v34 = vunpack.c.h.bf16 %v2693_v22  ;;  %v2698_v35 = vld [vmem:[%s3237_s12 + $0x60] sm:$0xff]  }
  0x17   : > { %438 = vst.msk [vmem:[#allocation2 + $0x20] sm:$0xff] %vm433_vm1, %v2617_v17  ;;  %439 = vst.msk [vmem:[#allocation2 + $0x28] sm:$0xff] %vm433_vm1, %v2618_v18  ;;  %v2699_v36 = vld [vmem:[%s3237_s12 + $0x68] sm:$0xff]   ;;  %v2641_v37 = vunpack.c.l.bf16 %v2694_v23  ;;  %v2642_v38 = vunpack.c.h.bf16 %v2694_v23  ;;  %v2645_v39 = vunpack.c.l.bf16 %v2695_v28  ;;  %v2646_v40 = vunpack.c.h.bf16 %v2695_v28  ;;  %v2700_v41 = vld [vmem:[%s3237_s12 + $0x70] sm:$0xff]  }
  0x18   : > { %440 = vst.msk [vmem:[#allocation2 + $0x30] sm:$0xff] %vm433_vm1, %v2621_v19  ;;  %441 = vst.msk [vmem:[#allocation2 + $0x38] sm:$0xff] %vm433_vm1, %v2622_v20  ;;  %v2701_v42 = vld [vmem:[%s3237_s12 + $0x78] sm:$0xff]   ;;  %v2702_v43 = vld [vmem:[%s3237_s12 + $0x80] sm:$0xff]   ;;  %v2649_v44 = vunpack.c.l.bf16 %v2696_v29  ;;  %v2650_v45 = vunpack.c.h.bf16 %v2696_v29  ;;  %v2653_v46 = vunpack.c.l.bf16 %v2697_v30  ;;  %v2654_v47 = vunpack.c.h.bf16 %v2697_v30 }
  0x19   : > { %442 = vst.msk [vmem:[#allocation2 + $0x40] sm:$0xff] %vm433_vm1, %v2625_v24  ;;  %443 = vst.msk [vmem:[#allocation2 + $0x48] sm:$0xff] %vm433_vm1, %v2626_v25  ;;  %v2703_v48 = vld [vmem:[%s3237_s12 + $0x88] sm:$0xff]   ;;  %v2704_v49 = vld [vmem:[%s3237_s12 + $0x90] sm:$0xff]   ;;  %v2657_v51 = vunpack.c.l.bf16 %v2698_v35  ;;  %v2658_v52 = vunpack.c.h.bf16 %v2698_v35  ;;  %v2661_v53 = vunpack.c.l.bf16 %v2699_v36  ;;  %v2662_v54 = vunpack.c.h.bf16 %v2699_v36 }
  0x1a   : > { %444 = vst.msk [vmem:[#allocation2 + $0x50] sm:$0xff] %vm433_vm1, %v2629_v26  ;;  %445 = vst.msk [vmem:[#allocation2 + $0x58] sm:$0xff] %vm433_vm1, %v2630_v27  ;;  %v393_v50 = vld [vmem:[%s3237_s12 + $0x98] sm:$0xf]  ;;  %v2684_v55 = vld [vmem:[%s3267_s16] sm:$0xff]   ;;  %v2665_v56 = vunpack.c.l.bf16 %v2700_v41  ;;  %v2666_v57 = vunpack.c.h.bf16 %v2700_v41  ;;  %v2669_v58 = vunpack.c.l.bf16 %v2701_v42  ;;  %v2670_v59 = vunpack.c.h.bf16 %v2701_v42 }
  0x1b   : > { %446 = vst.msk [vmem:[#allocation2 + $0x60] sm:$0xff] %vm433_vm1, %v2633_v31  ;;  %447 = vst.msk [vmem:[#allocation2 + $0x68] sm:$0xff] %vm433_vm1, %v2634_v32  ;;  %v475_v60 = vld [vmem:[%s3267_s16 + $0x8] sm:$0xf]  ;;  %v2673_v61 = vunpack.c.l.bf16 %v2702_v43  ;;  %v2674_v62 = vunpack.c.h.bf16 %v2702_v43  ;;  %v2677_v63 = vunpack.c.l.bf16 %v2703_v48  ;;  %v2678_v0 = vunpack.c.h.bf16 %v2703_v48  ;;  %v1902_v32 = vld [vmem:[%s3330_s24] sm:$0xff] }
  0x1c   : > { %448 = vst.msk [vmem:[#allocation2 + $0x70] sm:$0xff] %vm433_vm1, %v2637_v33  ;;  %449 = vst.msk [vmem:[#allocation2 + $0x78] sm:$0xff] %vm433_vm1, %v2638_v34  ;;  %v522_v1 = vld [vmem:[#allocation2 + $0x1] sm:$0xff]  ;;  %v2681_v6 = vunpack.c.l.bf16 %v2704_v49  ;;  %v2682_v7 = vunpack.c.h.bf16 %v2704_v49  ;;  %v432_v8 = vunpack.c.l.bf16 %v393_v50  ;;  %v2685_v9 = vunpack.c.l.bf16 %v2684_v55  ;;  %1943 = vperm.xlu0 %3106, %v1902_v32   ;;  %v1904_v36 = vld [vmem:[%s3330_s24 + $0x10] sm:$0xff] }
  0x1d   : > { %450 = vst.msk [vmem:[#allocation2 + $0x80] sm:$0xff] %vm433_vm1, %v2641_v37  ;;  %451 = vst.msk [vmem:[#allocation2 + $0x88] sm:$0xff] %vm433_vm1, %v2642_v38  ;;  %v523_v2 = vld [vmem:[#allocation2 + $0x9] sm:$0xff]  ;;  %v1192_v3 = vld [vmem:[#allocation2 + $0x11] sm:$0xff]  ;;  %v2686_v14 = vunpack.c.h.bf16 %v2684_v55  ;;  %v478_v15 = vunpack.c.l.bf16 %v475_v60  ;;  %v998_v17 = vsel %vm643_vm0, %v3220_v4, 0  ;;  %v1669_v21 = vsel %vm643_vm0, %v3227_v5, 0  ;;  %1953 = vperm.xlu1 %3107, %v1904_v36  }
  0x1e   : > { %452 = vst.msk [vmem:[#allocation2 + $0x90] sm:$0xff] %vm433_vm1, %v2645_v39  ;;  %453 = vst.msk [vmem:[#allocation2 + $0x98] sm:$0xff] %vm433_vm1, %v2646_v40  ;;  %v561_v10 = vpack.c.bf16 %v523_v2, %v522_v1  ;;  %v1193_v11 = vld [vmem:[#allocation2 + $0x19] sm:$0xff]  ;;  %v1194_v12 = vld [vmem:[#allocation2 + $0x21] sm:$0xff] }
  0x1f   : > { %454 = vst.msk [vmem:[#allocation2 + $0xa0] sm:$0xff] %vm433_vm1, %v2649_v44  ;;  %455 = vst.msk [vmem:[#allocation2 + $0xa8] sm:$0xff] %vm433_vm1, %v2650_v45  ;;  %v1195_v13 = vld [vmem:[#allocation2 + $0x29] sm:$0xff]  ;;  %v1231_v16 = vpack.c.bf16 %v1193_v11, %v1192_v3  ;;  %v1196_v19 = vld [vmem:[#allocation2 + $0x31] sm:$0xff] }
  0x20   : > { %456 = vst.msk [vmem:[#allocation2 + $0xb0] sm:$0xff] %vm433_vm1, %v2653_v46  ;;  %457 = vst.msk [vmem:[#allocation2 + $0xb8] sm:$0xff] %vm433_vm1, %v2654_v47  ;;  %v1232_v18 = vpack.c.bf16 %v1195_v13, %v1194_v12  ;;  %v1197_v20 = vld [vmem:[#allocation2 + $0x39] sm:$0xff]  ;;  %2791 = vmatprep.mubr.msk.bf16.mxu1 %vm433_vm1, %v561_v10  ;;  %v1198_v4 = vld [vmem:[#allocation2 + $0x41] sm:$0xff] }
  0x21   : > { %458 = vst.msk [vmem:[#allocation2 + $0xc0] sm:$0xff] %vm433_vm1, %v2657_v51  ;;  %459 = vst.msk [vmem:[#allocation2 + $0xc8] sm:$0xff] %vm433_vm1, %v2658_v52  ;;  %v1233_v22 = vpack.c.bf16 %v1197_v20, %v1196_v19  ;;  %2875 = vmatprep.mubr.msk.bf16.mxu0 %vm433_vm1, %v1231_v16  ;;  %2792 = vmatmul.mubr.msk.bf16.vlgmr.msra.gmra.mrb[0].mxu1 %vm433_vm1, %v1231_v16  ;;  %v1199_v23 = vld [vmem:[#allocation2 + $0x49] sm:$0xff]  ;;  %v1200_v5 = vld [vmem:[#allocation2 + $0x51] sm:$0xff] }
  0x22   : > { %460 = vst.msk [vmem:[#allocation2 + $0xd0] sm:$0xff] %vm433_vm1, %v2661_v53  ;;  %461 = vst.msk [vmem:[#allocation2 + $0xd8] sm:$0xff] %vm433_vm1, %v2662_v54  ;;  %2832 = vmatpush3.bf16.msra.mxu1 %v998_v17  ;;  %2876 = vmatmul.mubr.msk.bf16.vlgmr.msra.gmra.mrb[0].mxu0 %vm433_vm1, %v1232_v18  ;;  %v1201_v24 = vld [vmem:[#allocation2 + $0x59] sm:$0xff]  ;;  %v1234_v25 = vpack.c.bf16 %v1199_v23, %v1198_v4  ;;  %v1202_v27 = vld [vmem:[#allocation2 + $0x61] sm:$0xff] }
  0x23   : > { %462 = vst.msk [vmem:[#allocation2 + $0xe0] sm:$0xff] %vm433_vm1, %v2665_v56  ;;  %463 = vst.msk [vmem:[#allocation2 + $0xe8] sm:$0xff] %vm433_vm1, %v2666_v57  ;;  %2916 = vmatpush3.bf16.msra.mxu0 %v1669_v21  ;;  %2795 = vmatprep.mubr.msk.bf16.mxu1 %vm433_vm1, %v1232_v18  ;;  %v1235_v26 = vpack.c.bf16 %v1201_v24, %v1200_v5  ;;  %v1203_v28 = vld [vmem:[#allocation2 + $0x69] sm:$0xff]  ;;  %v1204_v29 = vld [vmem:[#allocation2 + $0x71] sm:$0xff] }
  0x24   : > { %464 = vst.msk [vmem:[#allocation2 + $0xf0] sm:$0xff] %vm433_vm1, %v2669_v58  ;;  %465 = vst.msk [vmem:[#allocation2 + $0xf8] sm:$0xff] %vm433_vm1, %v2670_v59  ;;  %2879 = vmatprep.mubr.msk.bf16.mxu0 %vm433_vm1, %v1233_v22  ;;  %v1205_v30 = vld [vmem:[#allocation2 + $0x79] sm:$0xff]  ;;  %v1236_v31 = vpack.c.bf16 %v1203_v28, %v1202_v27  ;;  %v1903_v34 = vld [vmem:[%s3330_s24 + $0x8] sm:$0xff] }
  0x25   : > { %466 = vst.msk [vmem:[#allocation2 + $0x100] sm:$0xff] %vm433_vm1, %v2673_v61  ;;  %467 = vst.msk [vmem:[#allocation2 + $0x108] sm:$0xff] %vm433_vm1, %v2674_v62  ;;  %v1237_v33 = vpack.c.bf16 %v1205_v30, %v1204_v29  ;;  %v1206_v35 = vld [vmem:[#allocation2 + $0x81] sm:$0xff]  ;;  %v1207_v37 = vld [vmem:[#allocation2 + $0x89] sm:$0xff]  ;;  %1948 = vperm.xlu0 %3106, %v1903_v34  }
  0x26   : > { %468 = vst.msk [vmem:[#allocation2 + $0x110] sm:$0xff] %vm433_vm1, %v2677_v63  ;;  %469 = vst.msk [vmem:[#allocation2 + $0x118] sm:$0xff] %vm433_vm1, %v2678_v0  ;;  %v1208_v38 = vld [vmem:[#allocation2 + $0x91] sm:$0xff]  ;;  %v1209_v39 = vld [vmem:[#allocation2 + $0x99] sm:$0xff]  ;;  %v1238_v42 = vpack.c.bf16 %v1207_v37, %v1206_v35 }
  0x27   : > { %470 = vst.msk [vmem:[#allocation2 + $0x120] sm:$0xff] %vm433_vm1, %v2681_v6  ;;  %471 = vst.msk [vmem:[#allocation2 + $0x128] sm:$0xff] %vm433_vm1, %v2682_v7  ;;  %v1906_v40 = vld [vmem:[%s3330_s24 + $0x20] sm:$0xff]  ;;  %v1905_v41 = vld [vmem:[%s3330_s24 + $0x18] sm:$0xff]  ;;  %v1239_v43 = vpack.c.bf16 %v1209_v39, %v1208_v38 }
  0x28   : > { %472 = vst.msk [vmem:[#allocation2 + $0x130] sm:$0xff] %vm433_vm1, %v432_v8  ;;  %479 = vst.msk [vmem:[#allocation2 + $0x138] sm:$0xff] %vm433_vm1, %v2685_v9  ;;  %1958 = vperm.xlu1 %3107, %v1905_v41   ;;  %v1908_v44 = vld [vmem:[%s3330_s24 + $0x30] sm:$0xff]  ;;  %v1907_v45 = vld [vmem:[%s3330_s24 + $0x28] sm:$0xff] }
  0x29   : > { %480 = vst.msk [vmem:[#allocation2 + $0x140] sm:$0xff] %vm433_vm1, %v2686_v14  ;;  %481 = vst.msk [vmem:[#allocation2 + $0x148] sm:$0xff] %vm433_vm1, %v478_v15  ;;  %2796 = vmatmul.mubr.msk.bf16.gmra.mrb[4].mxu1 %vm433_vm1, %v1233_v22  ;;  %1963 = vperm.xlu0 %3106, %v1906_v40   ;;  %v1210_v46 = vld [vmem:[#allocation2 + $0xa1] sm:$0xff]  ;;  %v1211_v47 = vld [vmem:[#allocation2 + $0xa9] sm:$0xff] }
  0x2a   : > { %2880 = vmatmul.mubr.msk.bf16.gmra.mrb[4].mxu0 %vm433_vm1, %v1234_v25  ;;  %2799 = vmatprep.mubr.msk.bf16.mxu1 %vm433_vm1, %v1234_v25  ;;  %v1212_v48 = vld [vmem:[#allocation2 + $0xb1] sm:$0xff]  ;;  %v1213_v49 = vld [vmem:[#allocation2 + $0xb9] sm:$0xff]  ;;  %v1240_v52 = vpack.c.bf16 %v1211_v47, %v1210_v46  ;;  %v1911_v55 = vld [vmem:[%s3330_s24 + $0x48] sm:$0xff] }
  0x2b   : > { %2883 = vmatprep.mubr.msk.bf16.mxu0 %vm433_vm1, %v1235_v26  ;;  %v1910_v50 = vld [vmem:[%s3330_s24 + $0x40] sm:$0xff]  ;;  %v1909_v51 = vld [vmem:[%s3330_s24 + $0x38] sm:$0xff]  ;;  %v1241_v53 = vpack.c.bf16 %v1213_v49, %v1212_v48  ;;  %v1912_v54 = vld [vmem:[%s3330_s24 + $0x50] sm:$0xff] }
  0x2c   : > { %1968 = vperm.xlu1 %3107, %v1907_v45   ;;  %v1214_v56 = vld [vmem:[#allocation2 + $0xc1] sm:$0xff]  ;;  %v1215_v57 = vld [vmem:[#allocation2 + $0xc9] sm:$0xff]  ;;  %v1216_v58 = vld [vmem:[#allocation2 + $0xd1] sm:$0xff] }
  0x2d   : > { %1973 = vperm.xlu0 %3106, %v1908_v44   ;;  %v1217_v59 = vld [vmem:[#allocation2 + $0xd9] sm:$0xff]  ;;  %v1242_v62 = vpack.c.bf16 %v1215_v57, %v1214_v56  ;;  %v1916_v0 = vld [vmem:[%s3330_s24 + $0x70] sm:$0xff]  ;;  %v1915_v1 = vld [vmem:[%s3330_s24 + $0x68] sm:$0xff] }
  0x2e   : > { %v1914_v60 = vld [vmem:[%s3330_s24 + $0x60] sm:$0xff]  ;;  %v1913_v61 = vld [vmem:[%s3330_s24 + $0x58] sm:$0xff]  ;;  %v1243_v63 = vpack.c.bf16 %v1217_v59, %v1216_v58  ;;  %v1219_v3 = vld [vmem:[#allocation2 + $0xe9] sm:$0xff] }
  0x2f   : > { %v1218_v2 = vld [vmem:[#allocation2 + $0xe1] sm:$0xff]  ;;  %v1220_v6 = vld [vmem:[#allocation2 + $0xf1] sm:$0xff]  ;;  %v1221_v7 = vld [vmem:[#allocation2 + $0xf9] sm:$0xff] }
  0x30   : > { %1978 = vperm.xlu1 %3107, %v1909_v51   ;;  %v1918_v8 = vld [vmem:[%s3330_s24 + $0x80] sm:$0xff]  ;;  %v1917_v9 = vld [vmem:[%s3330_s24 + $0x78] sm:$0xff]  ;;  %v1244_v10 = vpack.c.bf16 %v1219_v3, %v1218_v2  ;;  %v1245_v11 = vpack.c.bf16 %v1221_v7, %v1220_v6  ;;  %v1920_v12 = vld [vmem:[%s3330_s24 + $0x90] sm:$0xff] }
  0x31   : > { %2800 = vmatmul.mubr.msk.bf16.gmra.mrb[8].mxu1 %vm433_vm1, %v1235_v26  ;;  %1983 = vperm.xlu0 %3106, %v1910_v50   ;;  %v1919_v13 = vld [vmem:[%s3330_s24 + $0x88] sm:$0xff]  ;;  %v1224_v16 = vld [vmem:[#allocation2 + $0x111] sm:$0xff]  ;;  %v1225_v17 = vld [vmem:[#allocation2 + $0x119] sm:$0xff] }
  0x32   : > { %2884 = vmatmul.mubr.msk.bf16.gmra.mrb[8].mxu0 %vm433_vm1, %v1236_v31  ;;  %2803 = vmatprep.mubr.msk.bf16.mxu1 %vm433_vm1, %v1236_v31  ;;  %v1222_v14 = vld [vmem:[#allocation2 + $0x101] sm:$0xff]  ;;  %v1223_v15 = vld [vmem:[#allocation2 + $0x109] sm:$0xff]  ;;  %v1921_v19 = vld [vmem:[%s3330_s24 + $0x98] sm:$0xff]  ;;  %v1247_v21 = vpack.c.bf16 %v1225_v17, %v1224_v16 }
  0x33   : > { %2887 = vmatprep.mubr.msk.bf16.mxu0 %vm433_vm1, %v1237_v33  ;;  %v1922_v18 = vld [vmem:[%s3330_s24 + $0xa0] sm:$0xff]  ;;  %v1246_v20 = vpack.c.bf16 %v1223_v15, %v1222_v14  ;;  %v1924_v22 = vld [vmem:[%s3330_s24 + $0xb0] sm:$0xff]  ;;  %v1923_v4 = vld [vmem:[%s3330_s24 + $0xa8] sm:$0xff] }
  0x34   : > { %1988 = vperm.xlu1 %3107, %v1911_v55   ;;  %v1226_v23 = vld [vmem:[#allocation2 + $0x121] sm:$0xff]  ;;  %v1227_v5 = vld [vmem:[#allocation2 + $0x129] sm:$0xff]  ;;  %v1228_v24 = vld [vmem:[#allocation2 + $0x131] sm:$0xff] }
  0x35   : > { %1993 = vperm.xlu0 %3106, %v1912_v54   ;;  %v1229_v25 = vld [vmem:[#allocation2 + $0x139] sm:$0xff]  ;;  %v1248_v28 = vpack.c.bf16 %v1227_v5, %v1226_v23  ;;  %v1928_v30 = vld [vmem:[%s3330_s24 + $0xd0] sm:$0xff]  ;;  %v1927_v31 = vld [vmem:[%s3330_s24 + $0xc8] sm:$0xff]  ;;  %v580_v36 = vpack.c.bf16 %v1228_v24, %v1228_v24 }
  0x36   : > { %v1926_v26 = vld [vmem:[%s3330_s24 + $0xc0] sm:$0xff]  ;;  %v1925_v27 = vld [vmem:[%s3330_s24 + $0xb8] sm:$0xff]  ;;  %v1249_v29 = vpack.c.bf16 %v1229_v25, %v1228_v24  ;;  %v1932_v41 = vld [vmem:[%s3330_s24 + $0xf0] sm:$0xff] }
  0x37   : > { %v1230_v32 = vld [vmem:[#allocation2 + $0x141] sm:$0xff]  ;;  %v1929_v37 = vld [vmem:[%s3330_s24 + $0xd8] sm:$0xff]  ;;  %v1550_v44 = vld [vmem:[#allocation2 + $0x2a] sm:$0xff] }
  0x38   : > { %1998 = vperm.xlu1 %3107, %v1913_v61   ;;  %v1548_v34 = vld [vmem:[#allocation2 + $0x1a] sm:$0xff]  ;;  %v1250_v38 = vpack.c.bf16 %v1230_v32, %v1230_v32  ;;  %v1551_v45 = vld [vmem:[#allocation2 + $0x32] sm:$0xff]  ;;  %v3109_v48 = vld [vmem:[%s3237_s12 + $0x8] sm:$0xff]  }
  0x39   : > { %2804 = vmatmul.mubr.msk.bf16.gmra.mrb[12].mxu1 %vm433_vm1, %v1237_v33  ;;  %2003 = vperm.xlu0 %3106, %v1914_v60   ;;  %v1547_v33 = vld [vmem:[#allocation2 + $0x12] sm:$0xff]  ;;  %v1930_v35 = vld [vmem:[%s3330_s24 + $0xe0] sm:$0xff]  ;;  %v1935_v54 = vld [vmem:[%s3330_s24 + $0x108] sm:$0xff] }
  0x3a   : > { %2888 = vmatmul.mubr.msk.bf16.gmra.mrb[12].mxu0 %vm433_vm1, %v1238_v42  ;;  %2807 = vmatprep.mubr.msk.bf16.mxu1 %vm433_vm1, %v1238_v42  ;;  %v3108_v39 = vld [vmem:[%s3237_s12] sm:$0xff]   ;;  %v1586_v40 = vpack.c.bf16 %v1548_v34, %v1547_v33  ;;  %v1931_v42 = vld [vmem:[%s3330_s24 + $0xe8] sm:$0xff]  ;;  %v1933_v49 = vld [vmem:[%s3330_s24 + $0xf8] sm:$0xff] }
  0x3b   : > { %2891 = vmatprep.mubr.msk.bf16.mxu0 %vm433_vm1, %v1239_v43  ;;  %v1552_v46 = vld [vmem:[#allocation2 + $0x3a] sm:$0xff]  ;;  %v3110_v51 = vld [vmem:[%s3237_s12 + $0x10] sm:$0xff]   ;;  %v1553_v55 = vld [vmem:[#allocation2 + $0x42] sm:$0xff] }
  0x3c   : > { %2008 = vperm.xlu1 %3107, %v1915_v1   ;;  %v1934_v47 = vld [vmem:[%s3330_s24 + $0x100] sm:$0xff]  ;;  %v1554_v56 = vld [vmem:[#allocation2 + $0x4a] sm:$0xff]  ;;  %v1555_v57 = vld [vmem:[#allocation2 + $0x52] sm:$0xff] }
  0x3d   : > { %2013 = vperm.xlu0 %3106, %v1916_v0   ;;  %v1556_v58 = vld [vmem:[#allocation2 + $0x5a] sm:$0xff]  ;;  %v1940_v1 = vld [vmem:[%s3330_s24 + $0x130] sm:$0xff]  ;;  %v1939_v2 = vld [vmem:[%s3330_s24 + $0x128] sm:$0xff] }
  0x3e   : > { %v1938_v59 = vld [vmem:[%s3330_s24 + $0x120] sm:$0xff]  ;;  %v3111_v60 = vld [vmem:[%s3237_s12 + $0x18] sm:$0xff]   ;;  %v1590_v0 = vpack.c.bf16 %v1556_v58, %v1555_v57  ;;  %v1558_v6 = vld [vmem:[#allocation2 + $0x6a] sm:$0xff] }
  0x3f   : > { %v1937_v61 = vld [vmem:[%s3330_s24 + $0x118] sm:$0xff]  ;;  %v1557_v3 = vld [vmem:[#allocation2 + $0x62] sm:$0xff]  ;;  %v1562_v14 = vld [vmem:[#allocation2 + $0x8a] sm:$0xff] }
  0x40   : > { %2018 = vperm.xlu1 %3107, %v1917_v9   ;;  %v1559_v7 = vld [vmem:[#allocation2 + $0x72] sm:$0xff]  ;;  %v3113_v9 = vld [vmem:[%s3237_s12 + $0x28] sm:$0xff]   ;;  %v1564_v16 = vld [vmem:[#allocation2 + $0x9a] sm:$0xff] }
  0x41   : > { %2808 = vmatmul.mubr.msk.bf16.gmra.mrb[16].mxu1 %vm433_vm1, %v1239_v43  ;;  %2023 = vperm.xlu0 %3106, %v1918_v8   ;;  %v1549_v43 = vld [vmem:[#allocation2 + $0x22] sm:$0xff]  ;;  %v1560_v8 = vld [vmem:[#allocation2 + $0x7a] sm:$0xff]  ;;  %v1563_v15 = vld [vmem:[#allocation2 + $0x92] sm:$0xff] }
  0x42   : > { %2892 = vmatmul.mubr.msk.bf16.gmra.mrb[16].mxu0 %vm433_vm1, %v1240_v52  ;;  %2811 = vmatprep.mubr.msk.bf16.mxu1 %vm433_vm1, %v1240_v52  ;;  %v1587_v50 = vpack.c.bf16 %v1550_v44, %v1549_v43  ;;  %v1588_v52 = vpack.c.bf16 %v1552_v46, %v1551_v45  ;;  %v3115_v17 = vld [vmem:[%s3237_s12 + $0x38] sm:$0xff]   ;;  %v3117_v5 = vld [vmem:[%s3237_s12 + $0x48] sm:$0xff]   ;;  %v3118_v25 = vld [vmem:[%s3237_s12 + $0x50] sm:$0xff]  }
  0x43   : > { %2895 = vmatprep.mubr.msk.bf16.mxu0 %vm433_vm1, %v1241_v53  ;;  %v1568_v23 = vld [vmem:[#allocation2 + $0xba] sm:$0xff]  ;;  %v1577_v43 = vld [vmem:[#allocation2 + $0x102] sm:$0xff]  ;;  %v1578_v44 = vld [vmem:[#allocation2 + $0x10a] sm:$0xff] }
  0x44   : > { %2028 = vperm.xlu1 %3107, %v1919_v13   ;;  %v1561_v13 = vld [vmem:[#allocation2 + $0x82] sm:$0xff]  ;;  %v1579_v45 = vld [vmem:[#allocation2 + $0x112] sm:$0xff]  ;;  %v1580_v46 = vld [vmem:[#allocation2 + $0x11a] sm:$0xff] }
  0x45   : > { %2033 = vperm.xlu0 %3106, %v1920_v12   ;;  %v1592_v12 = vpack.c.bf16 %v1560_v8, %v1559_v7  ;;  %v3120_v33 = vld [vmem:[%s3237_s12 + $0x60] sm:$0xff]   ;;  %v3126_v57 = vld [vmem:[%s3237_s12 + $0x90] sm:$0xff]  }
  0x48   : > { %2038 = vperm.xlu1 %3107, %v1921_v19   ;;  %v3116_v19 = vld [vmem:[%s3237_s12 + $0x40] sm:$0xff]  }
  0x49   : > { %2812 = vmatmul.mubr.msk.bf16.gmra.mrb[20].mxu1 %vm433_vm1, %v1241_v53  ;;  %2043 = vperm.xlu0 %3106, %v1922_v18   ;;  %v1936_v53 = vld [vmem:[%s3330_s24 + $0x110] sm:$0xff]  ;;  %v1593_v18 = vpack.c.bf16 %v1562_v14, %v1561_v13 }
  0x4a   : > { %2896 = vmatmul.mubr.msk.bf16.gmra.mrb[20].mxu0 %vm433_vm1, %v1242_v62  ;;  %2815 = vmatprep.mubr.msk.bf16.mxu1 %vm433_vm1, %v1242_v62  ;;  %v1589_v62 = vpack.c.bf16 %v1554_v56, %v1553_v55  ;;  %v3125_v55 = vld [vmem:[%s3237_s12 + $0x88] sm:$0xff]  }
  0x4b   : > { %2899 = vmatprep.mubr.msk.bf16.mxu0 %vm433_vm1, %v1243_v63 }
  0x4c   : > { %2048 = vperm.xlu1 %3107, %v1923_v4   ;;  %v1567_v4 = vld [vmem:[#allocation2 + $0xb2] sm:$0xff] }
  0x4d   : > { %2053 = vperm.xlu0 %3106, %v1924_v22   ;;  %v1566_v22 = vld [vmem:[#allocation2 + $0xaa] sm:$0xff] }
  0x50   : > { %2058 = vperm.xlu1 %3107, %v1925_v27   ;;  %v1569_v27 = vld [vmem:[#allocation2 + $0xc2] sm:$0xff] }
  0x51   : > { %2816 = vmatmul.mubr.msk.bf16.gmra.mrb[24].mxu1 %vm433_vm1, %v1243_v63  ;;  %2063 = vperm.xlu0 %3106, %v1926_v26   ;;  %v3112_v63 = vld [vmem:[%s3237_s12 + $0x20] sm:$0xff]   ;;  %v1596_v26 = vpack.c.bf16 %v1568_v23, %v1567_v4 }
  0x52   : > { %2900 = vmatmul.mubr.msk.bf16.gmra.mrb[24].mxu0 %vm433_vm1, %v1244_v10  ;;  %2819 = vmatprep.mubr.msk.bf16.mxu1 %vm433_vm1, %v1244_v10  ;;  %v1591_v10 = vpack.c.bf16 %v1558_v6, %v1557_v3 }
  0x53   : > { %2903 = vmatprep.mubr.msk.bf16.mxu0 %vm433_vm1, %v1245_v11 }
  0x54   : > { %2068 = vperm.xlu1 %3107, %v1927_v31   ;;  %v3119_v31 = vld [vmem:[%s3237_s12 + $0x58] sm:$0xff]  }
  0x55   : > { %2073 = vperm.xlu0 %3106, %v1928_v30   ;;  %v1572_v30 = vld [vmem:[#allocation2 + $0xda] sm:$0xff] }
  0x58   : > { %2078 = vperm.xlu1 %3107, %v1929_v37   ;;  %v1575_v37 = vld [vmem:[#allocation2 + $0xf2] sm:$0xff] }
  0x59   : > { %2820 = vmatmul.mubr.msk.bf16.gmra.mrb[28].mxu1 %vm433_vm1, %v1245_v11  ;;  %2083 = vperm.xlu0 %3106, %v1930_v35   ;;  %v3114_v11 = vld [vmem:[%s3237_s12 + $0x30] sm:$0xff]   ;;  %v1573_v35 = vld [vmem:[#allocation2 + $0xe2] sm:$0xff] }
  0x5a   : > { %2904 = vmatmul.mubr.msk.bf16.gmra.mrb[28].mxu0 %vm433_vm1, %v1246_v20  ;;  %2823 = vmatprep.mubr.msk.bf16.mxu1 %vm433_vm1, %v1246_v20  ;;  %v1594_v20 = vpack.c.bf16 %v1564_v16, %v1563_v15 }
  0x5b   : > { %2907 = vmatprep.mubr.msk.bf16.mxu0 %vm433_vm1, %v1247_v21 }
  0x5c   : > { %2088 = vperm.xlu1 %3107, %v1931_v42  }
  0x5d   : > { %2093 = vperm.xlu0 %3106, %v1932_v41   ;;  %v3122_v41 = vld [vmem:[%s3237_s12 + $0x70] sm:$0xff]  }
  0x60   : > { %2098 = vperm.xlu1 %3107, %v1933_v49   ;;  %v3124_v49 = vld [vmem:[%s3237_s12 + $0x80] sm:$0xff]  }
  0x61   : > { %2824 = vmatmul.mubr.msk.bf16.gmra.mrb[32].mxu1 %vm433_vm1, %v1247_v21  ;;  %2103 = vperm.xlu0 %3106, %v1934_v47   ;;  %v1565_v21 = vld [vmem:[#allocation2 + $0xa2] sm:$0xff]  ;;  %v3123_v47 = vld [vmem:[%s3237_s12 + $0x78] sm:$0xff]  }
  0x62   : > { %2908 = vmatmul.mubr.msk.bf16.gmra.mrb[32].mxu0 %vm433_vm1, %v1248_v28  ;;  %2827 = vmatprep.mubr.msk.bf16.mxu1 %vm433_vm1, %v1248_v28  ;;  %v1595_v24 = vpack.c.bf16 %v1566_v22, %v1565_v21  ;;  %v1570_v28 = vld [vmem:[#allocation2 + $0xca] sm:$0xff] }
  0x63   : > { %2911 = vmatprep.mubr.msk.bf16.mxu0 %vm433_vm1, %v1249_v29  ;;  %v1571_v29 = vld [vmem:[#allocation2 + $0xd2] sm:$0xff]  ;;  %v1597_v32 = vpack.c.bf16 %v1570_v28, %v1569_v27 }
  0x64   : > { %2108 = vperm.xlu1 %3107, %v1935_v54   ;;  %v1598_v34 = vpack.c.bf16 %v1572_v30, %v1571_v29  ;;  %v1584_v54 = vld [vmem:[#allocation2 + $0x13a] sm:$0xff] }
  0x65   : > { %2113 = vperm.xlu0 %3106, %v1936_v53   ;;  %v1583_v53 = vld [vmem:[#allocation2 + $0x132] sm:$0xff] }
  0x66   : > { %v1604_v58 = vpack.c.bf16 %v1584_v54, %v1583_v53 }
  0x68   : > { %2118 = vperm.xlu1 %3107, %v1937_v61  }
  0x69   : > { %2828 = vmatmul.mubr.msk.bf16.gmra.mrb[36].mxu1 %vm433_vm1, %v580_v36  ;;  %2123 = vperm.xlu0 %3106, %v1938_v59   ;;  %v1574_v36 = vld [vmem:[#allocation2 + $0xea] sm:$0xff]  ;;  %v1585_v59 = vld [vmem:[#allocation2 + $0x142] sm:$0xff] }
  0x6a   : > { %2912 = vmatmul.mubr.msk.bf16.gmra.mrb[36].mxu0 %vm433_vm1, %v1250_v38  ;;  %2833 = vmatprep.mubr.msk.bf16.mxu1 %vm433_vm1, %v3108_v39  ;;  %v1576_v38 = vld [vmem:[#allocation2 + $0xfa] sm:$0xff]  ;;  %v3121_v39 = vld [vmem:[%s3237_s12 + $0x68] sm:$0xff]   ;;  %v1605_v61 = vpack.c.bf16 %v1585_v59, %v1585_v59 }
  0x6b   : > { %2917 = vmatprep.mubr.msk.bf16.mxu0 %vm433_vm1, %v1586_v40  ;;  %v1599_v40 = vpack.c.bf16 %v1574_v36, %v1573_v35  ;;  %v1600_v42 = vpack.c.bf16 %v1576_v38, %v1575_v37 }
  0x6c   : > { %2128 = vperm.xlu1 %3107, %v1939_v2  }
  0x6d   : > { %2133 = vperm.xlu0 %3106, %v1940_v1  }
  0x71   : > { %2834 = vmatmul.mubr.msk.bf16.vlgmr.msra.gmra.mrb[0].mxu1 %vm433_vm1, %v3109_v48  ;;  %v1601_v48 = vpack.c.bf16 %v1578_v44, %v1577_v43 }
  0x72   : > { %2918 = vmatmul.mubr.msk.bf16.vlgmr.msra.gmra.mrb[0].mxu0 %vm433_vm1, %v1587_v50  ;;  %2837 = vmatprep.mubr.msk.bf16.mxu1 %vm433_vm1, %v3110_v51  ;;  %v1602_v50 = vpack.c.bf16 %v1580_v46, %v1579_v45  ;;  %v1581_v51 = vld [vmem:[#allocation2 + $0x122] sm:$0xff] }
  0x73   : > { %2921 = vmatprep.mubr.msk.bf16.mxu0 %vm433_vm1, %v1588_v52  ;;  %v1582_v52 = vld [vmem:[#allocation2 + $0x12a] sm:$0xff] }
  0x74   : > { %v1603_v56 = vpack.c.bf16 %v1582_v52, %v1581_v51 }
  0x79   : > { %2838 = vmatmul.mubr.msk.bf16.gmra.mrb[4].mxu1 %vm433_vm1, %v3111_v60  ;;  %v3127_v60 = vld [vmem:[%s3237_s12 + $0x98] ss:$0 sps:$4 sm:$0xff]  }
  0x7a   : > { %2922 = vmatmul.mubr.msk.bf16.gmra.mrb[4].mxu0 %vm433_vm1, %v1589_v62  ;;  %2841 = vmatprep.mubr.msk.bf16.mxu1 %vm433_vm1, %v3112_v63 }
  0x7b   : > { %2925 = vmatprep.mubr.msk.bf16.mxu0 %vm433_vm1, %v1590_v0  ;;  %v3153_v0 = vmov 0.0  }
  0x7c   : > { %353 = vst.msk [vmem:[%s3466_s28] sm:$0xff] %vm352_vm2, %v3153_v0  ;;  %354 = vst.msk [vmem:[%s3473_s6] sm:$0xff] %vm352_vm2, %v3153_v0 }
  0x81   : > { %2842 = vmatmul.mubr.msk.bf16.gmra.mrb[8].mxu1 %vm433_vm1, %v3113_v9 }
  0x82   : > { %2926 = vmatmul.mubr.msk.bf16.gmra.mrb[8].mxu0 %vm433_vm1, %v1591_v10  ;;  %2845 = vmatprep.mubr.msk.bf16.mxu1 %vm433_vm1, %v3114_v11 }
  0x83   : > { %2929 = vmatprep.mubr.msk.bf16.mxu0 %vm433_vm1, %v1592_v12 }
  0x89   : > { %2846 = vmatmul.mubr.msk.bf16.gmra.mrb[12].mxu1 %vm433_vm1, %v3115_v17 }
  0x8a   : > { %2930 = vmatmul.mubr.msk.bf16.gmra.mrb[12].mxu0 %vm433_vm1, %v1593_v18  ;;  %2849 = vmatprep.mubr.msk.bf16.mxu1 %vm433_vm1, %v3116_v19 }
  0x8b   : > { %2933 = vmatprep.mubr.msk.bf16.mxu0 %vm433_vm1, %v1594_v20 }
  0x91   : > { %2850 = vmatmul.mubr.msk.bf16.gmra.mrb[16].mxu1 %vm433_vm1, %v3117_v5 }
  0x92   : > { %2934 = vmatmul.mubr.msk.bf16.gmra.mrb[16].mxu0 %vm433_vm1, %v1595_v24  ;;  %2853 = vmatprep.mubr.msk.bf16.mxu1 %vm433_vm1, %v3118_v25 }
  0x93   : > { %2937 = vmatprep.mubr.msk.bf16.mxu0 %vm433_vm1, %v1596_v26 }
  0x99   : > { %2854 = vmatmul.mubr.msk.bf16.gmra.mrb[20].mxu1 %vm433_vm1, %v3119_v31 }
  0x9a   : > { %2938 = vmatmul.mubr.msk.bf16.gmra.mrb[20].mxu0 %vm433_vm1, %v1597_v32  ;;  %2857 = vmatprep.mubr.msk.bf16.mxu1 %vm433_vm1, %v3120_v33 }
  0x9b   : > { %2941 = vmatprep.mubr.msk.bf16.mxu0 %vm433_vm1, %v1598_v34  ;;  %v1944_v62 = vpop.permute.xlu0 %1943 }
  0x9c   : > { %v1954_v1 = vpop.permute.xlu1 %1953 }
  0xa1   : > { %2858 = vmatmul.mubr.msk.bf16.gmra.mrb[24].mxu1 %vm433_vm1, %v3121_v39 }
  0xa2   : > { %2942 = vmatmul.mubr.msk.bf16.gmra.mrb[24].mxu0 %vm433_vm1, %v1599_v40  ;;  %2861 = vmatprep.mubr.msk.bf16.mxu1 %vm433_vm1, %v3122_v41 }
  0xa3   : > { %2945 = vmatprep.mubr.msk.bf16.mxu0 %vm433_vm1, %v1600_v42 }
  0xa4   : > { %v1949_v63 = vpop.permute.xlu0 %1948 }
  0xa7   : > { %v1959_v3 = vpop.permute.xlu1 %1958 }
  0xa8   : > { %v1964_v2 = vpop.permute.xlu0 %1963 }
  0xa9   : > { %2862 = vmatmul.mubr.msk.bf16.gmra.mrb[28].mxu1 %vm433_vm1, %v3123_v47 }
  0xaa   : > { %2946 = vmatmul.mubr.msk.bf16.gmra.mrb[28].mxu0 %vm433_vm1, %v1601_v48  ;;  %2865 = vmatprep.mubr.msk.bf16.mxu1 %vm433_vm1, %v3124_v49 }
  0xab   : > { %2949 = vmatprep.mubr.msk.bf16.mxu0 %vm433_vm1, %v1602_v50  ;;  %v3477_v7 = vpop.permute.xlu1 %1968 }
  0xac   : > { %v1974_v6 = vpop.permute.xlu0 %1973 }
  0xaf   : > { %v3481_v9 = vpop.permute.xlu1 %1978 }
  0xb0   : > { %v3479_v8 = vpop.permute.xlu0 %1983 }
  0xb1   : > { %2866 = vmatmul.mubr.msk.bf16.gmra.mrb[32].mxu1 %vm433_vm1, %v3125_v55 }
  0xb2   : > { %2950 = vmatmul.mubr.msk.bf16.gmra.mrb[32].mxu0 %vm433_vm1, %v1603_v56  ;;  %2869 = vmatprep.mubr.msk.bf16.mxu1 %vm433_vm1, %v3126_v57 }
  0xb3   : > { %2953 = vmatprep.mubr.msk.bf16.mxu0 %vm433_vm1, %v1604_v58  ;;  %v3485_v11 = vpop.permute.xlu1 %1988 }
  0xb4   : > { %v3483_v10 = vpop.permute.xlu0 %1993 }
  0xb7   : > { %v3489_v13 = vpop.permute.xlu1 %1998 }
  0xb8   : > { %v3487_v12 = vpop.permute.xlu0 %2003 }
  0xb9   : > { %2870 = vmatmul.mubr.msk.bf16.gmra.mrb[36].mxu1 %vm433_vm1, %v3127_v60 }
  0xba   : > { %2954 = vmatmul.mubr.msk.bf16.gmra.mrb[36].mxu0 %vm433_vm1, %v1605_v61 }
  0xbb   : > { %v3493_v15 = vpop.permute.xlu1 %2008 }
  0xbc   : > { %v3491_v14 = vpop.permute.xlu0 %2013 }
  0xbf   : > { %v3497_v17 = vpop.permute.xlu1 %2018 }
  0xc0   : > { %v3495_v16 = vpop.permute.xlu0 %2023 }
  0xc3   : > { %v3501_v19 = vpop.permute.xlu1 %2028 }
  0xc4   : > { %v3499_v18 = vpop.permute.xlu0 %2033 }
  0xc7   : > { %v3505_v36 = vpop.permute.xlu1 %2038 }
  0xc8   : > { %v3503_v32 = vpop.permute.xlu0 %2043 }
 0x144   : > { %v2835_v20 = vpop.f32.mrb[0].mxu1 }
 0x145   : > { %v2919_v21 = vpop.f32.mrb[0].mxu0  ;;  %v1034_v22 = vpop.f32.mrb[1].mxu1 }
 0x146   : > { %v2957_v4 = vadd.f32 %v2919_v21, %v2835_v20  ;;  %v1705_v23 = vpop.f32.mrb[1].mxu0  ;;  %v2836_v5 = vpop.f32.mrb[2].mxu1 }
 0x147   : > { %v2958_v24 = vadd.f32 %v1705_v23, %v1034_v22  ;;  %v2920_v25 = vpop.f32.mrb[2].mxu0  ;;  %v1037_v26 = vpop.f32.mrb[3].mxu1 }
 0x148   : > { %v2138_v27 = vmul.f32 %v2957_v4, %v1954_v1  ;;  %v2959_v28 = vadd.f32 %v2920_v25, %v2836_v5  ;;  %v1708_v29 = vpop.f32.mrb[3].mxu0  ;;  %v3519_v23 = vpop.permute.xlu1 %2048 }
 0x149   : > { %v2136_v30 = vmul.f32 %v2958_v24, %v1944_v62  ;;  %v2960_v31 = vadd.f32 %v1708_v29, %v1037_v26 }
 0x14a   : > { %v2139_v34 = vmul.f32 %v2959_v28, %v1959_v3  ;;  %v2259_v37 = vmul.f32 %v2138_v27, %v2138_v27  ;;  %v2180_v44 = vsel %vm352_vm2, %v2138_v27, 0.0  ;;  %v3514_v3 = vpop.permute.xlu0 %2053 }
 0x14b   : > { %v2257_v33 = vmul.f32 %v2136_v30, %v2136_v30  ;;  %v2137_v35 = vmul.f32 %v2960_v31, %v1949_v63  ;;  %v2177_v39 = vsel %vm352_vm2, %v2136_v30, 0.0 }
 0x14c   : > { %v2839_v38 = vpop.f32.mrb[4].mxu1  ;;  %v2260_v50 = vmul.f32 %v2139_v34, %v2139_v34  ;;  %v2299_v55 = vsel %vm352_vm2, %v2259_v37, 0.0  ;;  %v2182_v60 = vsel %vm352_vm2, %v2139_v34, 0.0 }
 0x14d   : > { %v2178_v40 = vsel %vm352_vm2, %v2137_v35, 0.0  ;;  %v2258_v41 = vmul.f32 %v2137_v35, %v2137_v35  ;;  %v2923_v42 = vpop.f32.mrb[4].mxu0  ;;  %v1050_v43 = vpop.f32.mrb[5].mxu1  ;;  %v2296_v49 = vsel %vm352_vm2, %v2257_v33, 0.0 }
 0x14e   : > { %v2179_v45 = vadd.f32 %v2178_v40, %v2177_v39  ;;  %v2961_v46 = vadd.f32 %v2923_v42, %v2839_v38  ;;  %v1721_v47 = vpop.f32.mrb[5].mxu0  ;;  %v2840_v48 = vpop.f32.mrb[6].mxu1  ;;  %v2301_v20 = vsel %vm352_vm2, %v2260_v50, 0.0 }
 0x14f   : > { %v2297_v51 = vsel %vm352_vm2, %v2258_v41, 0.0  ;;  %v2962_v52 = vadd.f32 %v1721_v47, %v1050_v43  ;;  %v2924_v53 = vpop.f32.mrb[6].mxu0  ;;  %v1053_v54 = vpop.f32.mrb[7].mxu1 }
 0x150   : > { %v2181_v56 = vadd.f32 %v2180_v44, %v2179_v45  ;;  %v2298_v57 = vadd.f32 %v2297_v51, %v2296_v49  ;;  %v2963_v58 = vadd.f32 %v2924_v53, %v2840_v48  ;;  %v1724_v59 = vpop.f32.mrb[7].mxu0  ;;  %v2142_v61 = vmul.f32 %v2961_v46, %v1974_v6 }
 0x151   : > { %v2140_v62 = vmul.f32 %v2962_v52, %v1964_v2  ;;  %v2964_v63 = vadd.f32 %v1724_v59, %v1053_v54  ;;  %v3530_v52 = vpop.permute.xlu0 %2063 }
 0x152   : > { %v2300_v0 = vadd.f32 %v2299_v55, %v2298_v57  ;;  %v2183_v1 = vadd.f32 %v2182_v60, %v2181_v56  ;;  %v2143_v25 = vmul.f32 %v2963_v58, %v3481_v9  ;;  %v2263_v2 = vmul.f32 %v2142_v61, %v2142_v61  ;;  %v3534_v57 = vpop.permute.xlu1 %2058 }
 0x153   : > { %v2184_v21 = vsel %vm352_vm2, %v2140_v62, 0.0  ;;  %v2261_v22 = vmul.f32 %v2140_v62, %v2140_v62  ;;  %v2141_v4 = vmul.f32 %v2964_v63, %v3477_v7  ;;  %v2188_v37 = vsel %vm352_vm2, %v2142_v61, 0.0 }
 0x154   : > { %v2185_v5 = vadd.f32 %v2184_v21, %v2183_v1  ;;  %v2302_v24 = vadd.f32 %v2301_v20, %v2300_v0  ;;  %v2843_v6 = vpop.f32.mrb[8].mxu1  ;;  %v2264_v9 = vmul.f32 %v2143_v25, %v2143_v25  ;;  %v2190_v45 = vsel %vm352_vm2, %v2143_v25, 0.0 }
 0x155   : > { %v2303_v26 = vsel %vm352_vm2, %v2261_v22, 0.0  ;;  %v2186_v27 = vsel %vm352_vm2, %v2141_v4, 0.0  ;;  %v2927_v28 = vpop.f32.mrb[8].mxu0  ;;  %v1066_v29 = vpop.f32.mrb[9].mxu1  ;;  %v2262_v33 = vmul.f32 %v2141_v4, %v2141_v4  ;;  %v2307_v49 = vsel %vm352_vm2, %v2263_v2, 0.0 }
 0x156   : > { %v2304_v30 = vadd.f32 %v2303_v26, %v2302_v24  ;;  %v2187_v31 = vadd.f32 %v2186_v27, %v2185_v5  ;;  %v2965_v34 = vadd.f32 %v2927_v28, %v2843_v6  ;;  %v1737_v35 = vpop.f32.mrb[9].mxu0  ;;  %v2844_v7 = vpop.f32.mrb[10].mxu1  ;;  %v2309_v58 = vsel %vm352_vm2, %v2264_v9, 0.0 }
 0x157   : > { %v2966_v38 = vadd.f32 %v1737_v35, %v1066_v29  ;;  %v2928_v39 = vpop.f32.mrb[10].mxu0  ;;  %v1069_v40 = vpop.f32.mrb[11].mxu1  ;;  %v2305_v42 = vsel %vm352_vm2, %v2262_v33, 0.0 }
 0x158   : > { %v2189_v41 = vadd.f32 %v2188_v37, %v2187_v31  ;;  %v2967_v43 = vadd.f32 %v2928_v39, %v2844_v7  ;;  %v1740_v44 = vpop.f32.mrb[11].mxu0  ;;  %v2306_v46 = vadd.f32 %v2305_v42, %v2304_v30  ;;  %v2146_v50 = vmul.f32 %v2965_v34, %v3483_v10  ;;  %v3550_v42 = vpop.permute.xlu1 %2068 }
 0x159   : > { %v2144_v47 = vmul.f32 %v2966_v38, %v3479_v8  ;;  %v2968_v48 = vadd.f32 %v1740_v44, %v1069_v40  ;;  %v3546_v38 = vpop.permute.xlu0 %2073 }
 0x15a   : > { %v2191_v51 = vadd.f32 %v2190_v45, %v2189_v41  ;;  %v2308_v53 = vadd.f32 %v2307_v49, %v2306_v46  ;;  %v2147_v8 = vmul.f32 %v2967_v43, %v3489_v13  ;;  %v2267_v20 = vmul.f32 %v2146_v50, %v2146_v50 }
 0x15b   : > { %v2192_v54 = vsel %vm352_vm2, %v2144_v47, 0.0  ;;  %v2265_v55 = vmul.f32 %v2144_v47, %v2144_v47  ;;  %v2145_v56 = vmul.f32 %v2968_v48, %v3485_v11  ;;  %v2196_v5 = vsel %vm352_vm2, %v2146_v50, 0.0 }
 0x15c   : > { %v2193_v59 = vadd.f32 %v2192_v54, %v2191_v51  ;;  %v2847_v60 = vpop.f32.mrb[12].mxu1  ;;  %v2310_v61 = vadd.f32 %v2309_v58, %v2308_v53  ;;  %v2268_v26 = vmul.f32 %v2147_v8, %v2147_v8  ;;  %v2198_v30 = vsel %vm352_vm2, %v2147_v8, 0.0 }
 0x15d   : > { %v2311_v10 = vsel %vm352_vm2, %v2265_v55, 0.0  ;;  %v2194_v62 = vsel %vm352_vm2, %v2145_v56, 0.0  ;;  %v2266_v63 = vmul.f32 %v2145_v56, %v2145_v56  ;;  %v2931_v0 = vpop.f32.mrb[12].mxu0  ;;  %v1082_v1 = vpop.f32.mrb[13].mxu1  ;;  %v2315_v35 = vsel %vm352_vm2, %v2267_v20, 0.0 }
 0x15e   : > { %v2195_v21 = vadd.f32 %v2194_v62, %v2193_v59  ;;  %v2969_v22 = vadd.f32 %v2931_v0, %v2847_v60  ;;  %v1753_v11 = vpop.f32.mrb[13].mxu0  ;;  %v2848_v4 = vpop.f32.mrb[14].mxu1  ;;  %v2312_v24 = vadd.f32 %v2311_v10, %v2310_v61  ;;  %v2317_v43 = vsel %vm352_vm2, %v2268_v26, 0.0 }
 0x15f   : > { %v2313_v25 = vsel %vm352_vm2, %v2266_v63, 0.0  ;;  %v2970_v13 = vadd.f32 %v1753_v11, %v1082_v1  ;;  %v2932_v6 = vpop.f32.mrb[14].mxu0  ;;  %v1085_v2 = vpop.f32.mrb[15].mxu1 }
 0x160   : > { %v2197_v27 = vadd.f32 %v2196_v5, %v2195_v21  ;;  %v2971_v28 = vadd.f32 %v2932_v6, %v2848_v4  ;;  %v1756_v29 = vpop.f32.mrb[15].mxu0  ;;  %v2314_v31 = vadd.f32 %v2313_v25, %v2312_v24  ;;  %v2150_v7 = vmul.f32 %v2969_v22, %v3491_v14  ;;  %v3562_v5 = vpop.permute.xlu0 %2083 }
 0x161   : > { %v2148_v33 = vmul.f32 %v2970_v13, %v3487_v12  ;;  %v2972_v34 = vadd.f32 %v1756_v29, %v1085_v2  ;;  %v3566_v2 = vpop.permute.xlu1 %2078 }
 0x162   : > { %v2199_v37 = vadd.f32 %v2198_v30, %v2197_v27  ;;  %v2316_v39 = vadd.f32 %v2315_v35, %v2314_v31  ;;  %v2151_v12 = vmul.f32 %v2971_v28, %v3497_v17  ;;  %v2271_v51 = vmul.f32 %v2150_v7, %v2150_v7 }
 0x163   : > { %v2200_v40 = vsel %vm352_vm2, %v2148_v33, 0.0  ;;  %v2269_v9 = vmul.f32 %v2148_v33, %v2148_v33  ;;  %v2149_v41 = vmul.f32 %v2972_v34, %v3493_v15  ;;  %v2204_v56 = vsel %vm352_vm2, %v2150_v7, 0.0 }
 0x164   : > { %v2201_v44 = vadd.f32 %v2200_v40, %v2199_v37  ;;  %v2851_v45 = vpop.f32.mrb[16].mxu1  ;;  %v2318_v46 = vadd.f32 %v2317_v43, %v2316_v39  ;;  %v2272_v61 = vmul.f32 %v2151_v12, %v2151_v12  ;;  %v2206_v0 = vsel %vm352_vm2, %v2151_v12, 0.0 }
 0x165   : > { %v2319_v14 = vsel %vm352_vm2, %v2269_v9, 0.0  ;;  %v2202_v47 = vsel %vm352_vm2, %v2149_v41, 0.0  ;;  %v2270_v48 = vmul.f32 %v2149_v41, %v2149_v41  ;;  %v2935_v49 = vpop.f32.mrb[16].mxu0  ;;  %v1098_v50 = vpop.f32.mrb[17].mxu1  ;;  %v2323_v22 = vsel %vm352_vm2, %v2271_v51, 0.0 }
 0x166   : > { %v2203_v53 = vadd.f32 %v2202_v47, %v2201_v44  ;;  %v2973_v54 = vadd.f32 %v2935_v49, %v2851_v45  ;;  %v1769_v15 = vpop.f32.mrb[17].mxu0  ;;  %v2852_v55 = vpop.f32.mrb[18].mxu1  ;;  %v2320_v58 = vadd.f32 %v2319_v14, %v2318_v46  ;;  %v2325_v26 = vsel %vm352_vm2, %v2272_v61, 0.0 }
 0x167   : > { %v2321_v59 = vsel %vm352_vm2, %v2270_v48, 0.0  ;;  %v2974_v17 = vadd.f32 %v1769_v15, %v1098_v50  ;;  %v2936_v8 = vpop.f32.mrb[18].mxu0  ;;  %v1101_v60 = vpop.f32.mrb[19].mxu1 }
 0x168   : > { %v2205_v10 = vadd.f32 %v2204_v56, %v2203_v53  ;;  %v2975_v62 = vadd.f32 %v2936_v8, %v2852_v55  ;;  %v1772_v63 = vpop.f32.mrb[19].mxu0  ;;  %v2322_v1 = vadd.f32 %v2321_v59, %v2320_v58  ;;  %v2154_v11 = vmul.f32 %v2973_v54, %v3499_v18  ;;  %v3578_v15 = vpop.permute.xlu0 %2093 }
 0x169   : > { %v2152_v20 = vmul.f32 %v2974_v17, %v3495_v16  ;;  %v2976_v21 = vadd.f32 %v1772_v63, %v1101_v60  ;;  %v3582_v17 = vpop.permute.xlu1 %2088 }
 0x16a   : > { %v2207_v4 = vadd.f32 %v2206_v0, %v2205_v10  ;;  %v2324_v24 = vadd.f32 %v2323_v22, %v2322_v1  ;;  %v2155_v16 = vmul.f32 %v2975_v62, %v3505_v36  ;;  %v2275_v35 = vmul.f32 %v2154_v11, %v2154_v11 }
 0x16b   : > { %v2208_v25 = vsel %vm352_vm2, %v2152_v20, 0.0  ;;  %v2273_v13 = vmul.f32 %v2152_v20, %v2152_v20  ;;  %v2153_v6 = vmul.f32 %v2976_v21, %v3501_v19  ;;  %v2212_v40 = vsel %vm352_vm2, %v2154_v11, 0.0 }
 0x16c   : > { %v2209_v27 = vadd.f32 %v2208_v25, %v2207_v4  ;;  %v2855_v28 = vpop.f32.mrb[20].mxu1  ;;  %v2326_v29 = vadd.f32 %v2325_v26, %v2324_v24  ;;  %v2276_v12 = vmul.f32 %v2155_v16, %v2155_v16  ;;  %v2214_v47 = vsel %vm352_vm2, %v2155_v16, 0.0 }
 0x16d   : > { %v2327_v18 = vsel %vm352_vm2, %v2273_v13, 0.0  ;;  %v2210_v30 = vsel %vm352_vm2, %v2153_v6, 0.0  ;;  %v2274_v31 = vmul.f32 %v2153_v6, %v2153_v6  ;;  %v2939_v33 = vpop.f32.mrb[20].mxu0  ;;  %v1114_v34 = vpop.f32.mrb[21].mxu1  ;;  %v2331_v51 = vsel %vm352_vm2, %v2275_v35, 0.0 }
 0x16e   : > { %v2211_v7 = vadd.f32 %v2210_v30, %v2209_v27  ;;  %v2977_v37 = vadd.f32 %v2939_v33, %v2855_v28  ;;  %v1785_v19 = vpop.f32.mrb[21].mxu0  ;;  %v2856_v39 = vpop.f32.mrb[22].mxu1  ;;  %v2328_v9 = vadd.f32 %v2327_v18, %v2326_v29  ;;  %v2333_v8 = vsel %vm352_vm2, %v2276_v12, 0.0 }
 0x16f   : > { %v2329_v41 = vsel %vm352_vm2, %v2274_v31, 0.0  ;;  %v2978_v36 = vadd.f32 %v1785_v19, %v1114_v34  ;;  %v2940_v43 = vpop.f32.mrb[22].mxu0  ;;  %v1117_v44 = vpop.f32.mrb[23].mxu1 }
 0x170   : > { %v2213_v45 = vadd.f32 %v2212_v40, %v2211_v7  ;;  %v2979_v46 = vadd.f32 %v2940_v43, %v2856_v39  ;;  %v1788_v14 = vpop.f32.mrb[23].mxu0  ;;  %v2330_v48 = vadd.f32 %v2329_v41, %v2328_v9  ;;  %v2158_v53 = vmul.f32 %v2977_v37, %v3514_v3  ;;  %v3594_v7 = vpop.permute.xlu0 %2103 }
 0x171   : > { %v2156_v49 = vmul.f32 %v2978_v36, %v3503_v32  ;;  %v2980_v50 = vadd.f32 %v1788_v14, %v1117_v44  ;;  %v2099_v9 = vpop.permute.xlu1 %2098 }
 0x172   : > { %v2215_v54 = vadd.f32 %v2214_v47, %v2213_v45  ;;  %v2332_v55 = vadd.f32 %v2331_v51, %v2330_v48  ;;  %v2159_v32 = vmul.f32 %v2979_v46, %v3534_v57  ;;  %v2279_v20 = vmul.f32 %v2158_v53, %v2158_v53 }
 0x173   : > { %v2216_v56 = vsel %vm352_vm2, %v2156_v49, 0.0  ;;  %v2277_v58 = vmul.f32 %v2156_v49, %v2156_v49  ;;  %v2157_v59 = vmul.f32 %v2980_v50, %v3519_v23  ;;  %v2220_v4 = vsel %vm352_vm2, %v2158_v53, 0.0 }
 0x174   : > { %v2217_v60 = vadd.f32 %v2216_v56, %v2215_v54  ;;  %v2859_v61 = vpop.f32.mrb[24].mxu1  ;;  %v2334_v10 = vadd.f32 %v2333_v8, %v2332_v55  ;;  %v2280_v26 = vmul.f32 %v2159_v32, %v2159_v32  ;;  %v2222_v29 = vsel %vm352_vm2, %v2159_v32, 0.0 }
 0x175   : > { %v2335_v3 = vsel %vm352_vm2, %v2277_v58, 0.0  ;;  %v2218_v62 = vsel %vm352_vm2, %v2157_v59, 0.0  ;;  %v2278_v63 = vmul.f32 %v2157_v59, %v2157_v59  ;;  %v2943_v0 = vpop.f32.mrb[24].mxu0  ;;  %v1130_v1 = vpop.f32.mrb[25].mxu1  ;;  %v2339_v33 = vsel %vm352_vm2, %v2279_v20, 0.0 }
 0x176   : > { %v2219_v21 = vadd.f32 %v2218_v62, %v2217_v60  ;;  %v2981_v22 = vadd.f32 %v2943_v0, %v2859_v61  ;;  %v1801_v23 = vpop.f32.mrb[25].mxu0  ;;  %v2860_v11 = vpop.f32.mrb[26].mxu1  ;;  %v2336_v24 = vadd.f32 %v2335_v3, %v2334_v10  ;;  %v2341_v41 = vsel %vm352_vm2, %v2280_v26, 0.0 }
 0x177   : > { %v2337_v25 = vsel %vm352_vm2, %v2278_v63, 0.0  ;;  %v2982_v57 = vadd.f32 %v1801_v23, %v1130_v1  ;;  %v2944_v13 = vpop.f32.mrb[26].mxu0  ;;  %v1133_v6 = vpop.f32.mrb[27].mxu1 }
 0x178   : > { %v2221_v27 = vadd.f32 %v2220_v4, %v2219_v21  ;;  %v2983_v16 = vadd.f32 %v2944_v13, %v2860_v11  ;;  %v1804_v28 = vpop.f32.mrb[27].mxu0  ;;  %v2338_v18 = vadd.f32 %v2337_v25, %v2336_v24  ;;  %v2162_v34 = vmul.f32 %v2981_v22, %v3546_v38  ;;  %v2114_v1 = vpop.permute.xlu0 %2113 }
 0x179   : > { %v2160_v30 = vmul.f32 %v2982_v57, %v3530_v52  ;;  %v2984_v31 = vadd.f32 %v1804_v28, %v1133_v6  ;;  %v2109_v11 = vpop.permute.xlu1 %2108 }
 0x17a   : > { %v2223_v35 = vadd.f32 %v2222_v29, %v2221_v27  ;;  %v2340_v37 = vadd.f32 %v2339_v33, %v2338_v18  ;;  %v2163_v52 = vmul.f32 %v2983_v16, %v3566_v2  ;;  %v2283_v47 = vmul.f32 %v2162_v34, %v2162_v34 }
 0x17b   : > { %v2224_v19 = vsel %vm352_vm2, %v2160_v30, 0.0  ;;  %v2281_v39 = vmul.f32 %v2160_v30, %v2160_v30  ;;  %v2161_v40 = vmul.f32 %v2984_v31, %v3550_v42  ;;  %v2228_v51 = vsel %vm352_vm2, %v2162_v34, 0.0 }
 0x17c   : > { %v2225_v36 = vadd.f32 %v2224_v19, %v2223_v35  ;;  %v2863_v43 = vpop.f32.mrb[28].mxu1  ;;  %v2342_v44 = vadd.f32 %v2341_v41, %v2340_v37  ;;  %v2284_v58 = vmul.f32 %v2163_v52, %v2163_v52  ;;  %v2230_v32 = vsel %vm352_vm2, %v2163_v52, 0.0 }
 0x17d   : > { %v2343_v12 = vsel %vm352_vm2, %v2281_v39, 0.0  ;;  %v2226_v38 = vsel %vm352_vm2, %v2161_v40, 0.0  ;;  %v2282_v45 = vmul.f32 %v2161_v40, %v2161_v40  ;;  %v2947_v46 = vpop.f32.mrb[28].mxu0  ;;  %v1146_v14 = vpop.f32.mrb[29].mxu1  ;;  %v2347_v62 = vsel %vm352_vm2, %v2283_v47, 0.0 }
 0x17e   : > { %v2227_v48 = vadd.f32 %v2226_v38, %v2225_v36  ;;  %v2985_v49 = vadd.f32 %v2947_v46, %v2863_v43  ;;  %v1817_v50 = vpop.f32.mrb[29].mxu0  ;;  %v2864_v42 = vpop.f32.mrb[30].mxu1  ;;  %v2344_v53 = vadd.f32 %v2343_v12, %v2342_v44  ;;  %v2349_v4 = vsel %vm352_vm2, %v2284_v58, 0.0 }
 0x17f   : > { %v2345_v54 = vsel %vm352_vm2, %v2282_v45, 0.0  ;;  %v2986_v2 = vadd.f32 %v1817_v50, %v1146_v14  ;;  %v2948_v55 = vpop.f32.mrb[30].mxu0  ;;  %v1149_v56 = vpop.f32.mrb[31].mxu1 }
 0x180   : > { %v2229_v59 = vadd.f32 %v2228_v51, %v2227_v48  ;;  %v2987_v8 = vadd.f32 %v2948_v55, %v2864_v42  ;;  %v1820_v60 = vpop.f32.mrb[31].mxu0  ;;  %v2346_v61 = vadd.f32 %v2345_v54, %v2344_v53  ;;  %v2166_v63 = vmul.f32 %v2985_v49, %v3578_v15  ;;  %v2124_v45 = vpop.permute.xlu0 %2123 }
 0x181   : > { %v2164_v10 = vmul.f32 %v2986_v2, %v3562_v5  ;;  %v2988_v3 = vadd.f32 %v1820_v60, %v1149_v56  ;;  %v2119_v46 = vpop.permute.xlu1 %2118 }
 0x182   : > { %v2231_v0 = vadd.f32 %v2230_v32, %v2229_v59  ;;  %v2348_v20 = vadd.f32 %v2347_v62, %v2346_v61  ;;  %v2167_v25 = vmul.f32 %v2987_v8, %v2099_v9  ;;  %v2287_v16 = vmul.f32 %v2166_v63, %v2166_v63 }
 0x183   : > { %v2232_v21 = vsel %vm352_vm2, %v2164_v10, 0.0  ;;  %v2285_v22 = vmul.f32 %v2164_v10, %v2164_v10  ;;  %v2165_v23 = vmul.f32 %v2988_v3, %v3582_v17  ;;  %v2236_v17 = vsel %vm352_vm2, %v2166_v63, 0.0 }
 0x184   : > { %v2233_v24 = vadd.f32 %v2232_v21, %v2231_v0  ;;  %v2867_v57 = vpop.f32.mrb[32].mxu1  ;;  %v2350_v5 = vadd.f32 %v2349_v4, %v2348_v20  ;;  %v2288_v19 = vmul.f32 %v2167_v25, %v2167_v25  ;;  %v2238_v41 = vsel %vm352_vm2, %v2167_v25, 0.0 }
 0x185   : > { %v2351_v13 = vsel %vm352_vm2, %v2285_v22, 0.0  ;;  %v2234_v6 = vsel %vm352_vm2, %v2165_v23, 0.0  ;;  %v2286_v15 = vmul.f32 %v2165_v23, %v2165_v23  ;;  %v2951_v26 = vpop.f32.mrb[32].mxu0  ;;  %v1162_v27 = vpop.f32.mrb[33].mxu1  ;;  %v2355_v44 = vsel %vm352_vm2, %v2287_v16, 0.0 }
 0x186   : > { %v2235_v28 = vadd.f32 %v2234_v6, %v2233_v24  ;;  %v2989_v29 = vadd.f32 %v2951_v26, %v2867_v57  ;;  %v1833_v18 = vpop.f32.mrb[33].mxu0  ;;  %v2868_v30 = vpop.f32.mrb[34].mxu1  ;;  %v2352_v31 = vadd.f32 %v2351_v13, %v2350_v5  ;;  %v2357_v50 = vsel %vm352_vm2, %v2288_v19, 0.0  ;;  %v2175_v19 = vld [vmem:[%s3466_s28] sm:$0xff] }
 0x187   : > { %v2353_v33 = vsel %vm352_vm2, %v2286_v15, 0.0  ;;  %v2990_v34 = vadd.f32 %v1833_v18, %v1162_v27  ;;  %v2952_v35 = vpop.f32.mrb[34].mxu0  ;;  %v1165_v37 = vpop.f32.mrb[35].mxu1 }
 0x188   : > { %v2237_v39 = vadd.f32 %v2236_v17, %v2235_v28  ;;  %v2991_v40 = vadd.f32 %v2952_v35, %v2868_v30  ;;  %v1836_v9 = vpop.f32.mrb[35].mxu0  ;;  %v2354_v36 = vadd.f32 %v2353_v33, %v2352_v31  ;;  %v2170_v12 = vmul.f32 %v2989_v29, %v2114_v1  ;;  %v2134_v23 = vpop.permute.xlu0 %2133 }
 0x189   : > { %v2168_v52 = vmul.f32 %v2990_v34, %v3594_v7  ;;  %v2992_v43 = vadd.f32 %v1836_v9, %v1165_v37  ;;  %v2129_v57 = vpop.permute.xlu1 %2128 }
 0x18a   : > { %v2239_v38 = vadd.f32 %v2238_v41, %v2237_v39  ;;  %v2356_v14 = vadd.f32 %v2355_v44, %v2354_v36  ;;  %v2171_v51 = vmul.f32 %v2991_v40, %v2119_v46  ;;  %v2291_v59 = vmul.f32 %v2170_v12, %v2170_v12 }
 0x18b   : > { %v2240_v47 = vsel %vm352_vm2, %v2168_v52, 0.0  ;;  %v2289_v48 = vmul.f32 %v2168_v52, %v2168_v52  ;;  %v2169_v49 = vmul.f32 %v2992_v43, %v2109_v11  ;;  %v2244_v10 = vsel %vm352_vm2, %v2170_v12, 0.0  ;;  %v2256_v52 = vld [vmem:[%s3473_s6] sm:$0xff] }
 0x18c   : > { %v2241_v42 = vadd.f32 %v2240_v47, %v2239_v38  ;;  %v2871_v53 = vpop.f32.mrb[36].mxu1  ;;  %v2358_v54 = vadd.f32 %v2357_v50, %v2356_v14  ;;  %v2292_v20 = vmul.f32 %v2171_v51, %v2171_v51  ;;  %v2246_v11 = vsel %vm352_vm2, %v2171_v51, 0.0 }
 0x18d   : > { %v2359_v7 = vsel %vm352_vm2, %v2289_v48, 0.0  ;;  %v2242_v2 = vsel %vm352_vm2, %v2169_v49, 0.0  ;;  %v2290_v55 = vmul.f32 %v2169_v49, %v2169_v49  ;;  %v2955_v56 = vpop.f32.mrb[36].mxu0  ;;  %v1178_v58 = vpop.f32.mrb[37].mxu1  ;;  %v2363_v5 = vsel %vm352_vm2, %v2291_v59, 0.0 }
 0x18e   : > { %v2243_v8 = vadd.f32 %v2242_v2, %v2241_v42  ;;  %v2993_v60 = vadd.f32 %v2955_v56, %v2871_v53  ;;  %v1849_v32 = vpop.f32.mrb[37].mxu0  ;;  %v2872_v61 = vpop.f32.mrb[38].mxu1  ;;  %v2360_v3 = vadd.f32 %v2359_v7, %v2358_v54  ;;  %v2365_v28 = vsel %vm352_vm2, %v2292_v20, 0.0 }
 0x18f   : > { %v2361_v62 = vsel %vm352_vm2, %v2290_v55, 0.0  ;;  %v2994_v63 = vadd.f32 %v1849_v32, %v1178_v58  ;;  %v2956_v0 = vpop.f32.mrb[38].mxu0  ;;  %v1181_v1 = vpop.f32.mrb[39].mxu1 }
 0x190   : > { %v2245_v21 = vadd.f32 %v2244_v10, %v2243_v8  ;;  %v1852_v22 = vpop.f32.mrb[39].mxu0  ;;  %v2362_v4 = vadd.f32 %v2361_v62, %v2360_v3  ;;  %v2174_v13 = vmul.f32 %v2993_v60, %v2134_v23 }
 0x191   : > { %v2172_v24 = vmul.f32 %v2994_v63, %v2124_v45  ;;  %v2995_v25 = vadd.f32 %v1852_v22, %v1181_v1 }
 0x192   : > { %v2247_v6 = vadd.f32 %v2246_v11, %v2245_v21  ;;  %v2364_v15 = vadd.f32 %v2363_v5, %v2362_v4  ;;  %v2295_v33 = vmul.f32 %v2174_v13, %v2174_v13  ;;  %v2252_v35 = vsel %vm352_vm2, %v2174_v13, 0.0 }
 0x193   : > { %v2248_v26 = vsel %vm352_vm2, %v2172_v24, 0.0  ;;  %v2293_v27 = vmul.f32 %v2172_v24, %v2172_v24  ;;  %v2173_v16 = vmul.f32 %v2995_v25, %v2129_v57 }
 0x194   : > { %v2249_v29 = vadd.f32 %v2248_v26, %v2247_v6  ;;  %v2366_v18 = vadd.f32 %v2365_v28, %v2364_v15  ;;  %v2371_v41 = vsel %vm352_vm2, %v2295_v33, 0.0 }
 0x195   : > { %v2367_v30 = vsel %vm352_vm2, %v2293_v27, 0.0  ;;  %v2250_v17 = vsel %vm352_vm2, %v2173_v16, 0.0  ;;  %v2294_v31 = vmul.f32 %v2173_v16, %v2173_v16 }
 0x196   : > { %v2251_v34 = vadd.f32 %v2250_v17, %v2249_v29  ;;  %v2368_v37 = vadd.f32 %v2367_v30, %v2366_v18 }
 0x197   : > { %v2369_v39 = vsel %vm352_vm2, %v2294_v31, 0.0 }
 0x198   : > { %v2253_v40 = vadd.f32 %v2252_v35, %v2251_v34  ;;  %v2370_v9 = vadd.f32 %v2369_v39, %v2368_v37 }
 0x19a   : > { %v2254_v36 = vadd.f32 %v2253_v40, %v2175_v19  ;;  %v2372_v43 = vadd.f32 %v2371_v41, %v2370_v9 }
 0x19c   : > { %2255 = vst.msk [vmem:[%s3466_s28] sm:$0xff] %vm352_vm2, %v2254_v36  ;;  %v2373_v44 = vadd.f32 %v2372_v43, %v2256_v52 }
 0x19e   : > { %2374 = vst.msk [vmem:[%s3473_s6] sm:$0xff] %vm352_vm2, %v2373_v44 }
 0x19f PF: > { %s16_s20 = sadd.s32 1, %s3150_s20   ;;  %s3654_s18 = smov %s3146_s19 }
 0x1a0   : > { %p13_p8 = scmp.ge.s32.totalorder %s16_s20, 4   ;;  %s3655_s19 = smov %s3657_s21 }
 0x1a2   :  { %15 = sbr.rel (!%p13_p8) target bundleno = 2 (0x2), region = 91 }

</bundles_post_ra>
